<compile_context>
chip_gen: v7x
topology: tpu7x:2x2x1
jax: 0.10.0
libtpu: 0.0.40
codegen_flags: <defaults>
</compile_context>

<pallas_src>
import functools

import jax
import jax.numpy as jnp
from jax.experimental import pallas as pl
from jax.experimental.pallas import tpu as pltpu

K = 7            # conv kernel size
PAD = (K - 1) // 2
BN_EPS = 1e-5


def _round_up(v, m):
    return (v + m - 1) // m * m


def _attention_gate_kernel(params_ref, colw_ref, x_ref, out_ref, *, nb, C, H, W, HWp):
    # params_ref : SMEM f32[2*K*K + 1] -- BN-folded conv weights
    #              (cin=0: channel-max plane, cin=1: channel-mean plane, each
    #               row-major over (kh, kw)), followed by the folded BN bias.
    # colw_ref   : VMEM i32[1, 2*HWp]  per-lane column index (j % W), tiled
    #              twice (once per stacked plane); pad lanes hold W.
    # x_ref      : VMEM [nb, C, HWp]   lane-dense, HW padded to HWp lanes
    # out_ref    : VMEM [nb, C, HWp]
    xf = x_ref[...].astype(jnp.float32)                        # (nb, C, HWp)

    # --- ZPool: max & mean over the channel (sublane) axis ------------------
    cmax = jnp.max(xf, axis=1)                                 # (nb, HWp)
    cmean = jnp.sum(xf, axis=1) * jnp.float32(1.0 / C)         # (nb, HWp)

    # Stack the two planes along the lane axis: [:, :HWp] = max, [:, HWp:] = mean.
    planes = jnp.concatenate([cmax, cmean], axis=1)            # (nb, 2*HWp)

    # Hoisted per-lane column index (broadcasts are not CSE'd inside loops).
    colw = jnp.broadcast_to(colw_ref[...], (nb, 2 * HWp))      # (nb, 2*HWp)

    # --- pre-roll by dw (horizontal taps), mask row-boundary crossings ------
    pre = []
    for kw in range(K):
        dw = kw - PAD
        if dw == 0:
            pre.append(planes)
            continue
        shifted = pltpu.roll(planes, (-dw) % (2 * HWp), 1)     # [i] = planes[i+dw]
        m = jnp.logical_and(colw >= -dw, colw < W - dw)
        pre.append(jnp.where(m, shifted, 0.0))

    # --- per-kh: weighted sum over (kw, plane), one roll by dh*W, row mask ---
    col = jax.lax.broadcasted_iota(jnp.int32, (nb, HWp), 1)    # flat spatial idx

    acc0 = jnp.zeros((nb, HWp), jnp.float32)
    acc1 = jnp.zeros((nb, HWp), jnp.float32)
    for kh in range(K):
        dh = kh - PAD
        s0 = jnp.zeros((nb, HWp), jnp.float32)
        s1 = jnp.zeros((nb, HWp), jnp.float32)
        for kw in range(K):
            w_max = params_ref[kh * K + kw]
            w_mean = params_ref[K * K + kh * K + kw]
            p = pre[kw]
            term = w_max * p[:, :HWp] + w_mean * p[:, HWp:]    # (nb, HWp)
            if kw % 2 == 0:
                s0 = s0 + term
            else:
                s1 = s1 + term
        s = s0 + s1
        if dh != 0:
            # rolled[i] = s[i + dh*W]; zero rows that fall outside the image.
            s = pltpu.roll(s, (-(dh * W)) % HWp, 1)
            r0 = max(0, -dh) * W
            r1 = (H - max(0, dh)) * W
            s = jnp.where(jnp.logical_and(col >= r0, col < r1), s, 0.0)
        if kh % 2 == 0:
            acc0 = acc0 + s
        else:
            acc1 = acc1 + s

    conv = acc0 + acc1                                         # (nb, HWp)
    bias = params_ref[2 * K * K]

    # --- folded BatchNorm bias + sigmoid gate + fused elementwise scale -----
    scale = jax.nn.sigmoid(conv + bias)                        # (nb, HWp)
    out_ref[...] = (xf * scale[:, None, :]).astype(out_ref.dtype)


def attention_gate(x, conv_w, bn_params, *, block_n=None):
    """x: [N, C, H, W]; conv_w: f32[1, 2, 7, 7] (OIHW);
    bn_params: f32[4] = (gamma, beta, running_mean, running_var)."""
    N, C, H, W = x.shape
    HW = H * W
    HWp = max(_round_up(HW, 128), 128)                 # lane-dense, unmasked stores

    # ---- fold eval-mode BatchNorm into the conv ---------------------------
    # BN(conv(z)) = conv(z) * s + (beta - mu * s),  s = gamma * rsqrt(var+eps)
    bn_params = bn_params.astype(jnp.float32)
    gamma, beta, mu, var = bn_params[0], bn_params[1], bn_params[2], bn_params[3]
    bn_s = gamma * jax.lax.rsqrt(var + BN_EPS)
    w_folded = conv_w.astype(jnp.float32).reshape(2 * K * K) * bn_s
    bias = (beta - mu * bn_s).reshape(1)
    params = jnp.concatenate([w_folded, bias])         # f32[99]

    # ---- lane-dense flat layout, HW padded to a multiple of 128 -----------
    x_flat = x.reshape(N, C, HW)
    if HWp != HW:
        x_flat = jnp.pad(x_flat, ((0, 0), (0, 0), (0, HWp - HW)))

    # Per-lane column index (avoids integer rem in-kernel); tiled twice for
    # the lane-stacked (max, mean) planes; pad lanes get W (all masks false).
    ids = jnp.arange(HWp, dtype=jnp.int32)
    colw = jnp.where(ids < HW, ids % W, W)
    colw2 = jnp.concatenate([colw, colw]).reshape(1, 2 * HWp)

    # ---- how many images per grid step -------------------------------------
    itemsize = jnp.dtype(x.dtype).itemsize
    if block_n is None:
        block_n = 1
        per_image = C * HWp * itemsize
        # Grow blocks toward ~2 MiB (HBM-roofline regime) but keep >= 2 grid
        # steps so both v7x TensorCores get work; odd N falls back to 1.
        while (N % (block_n * 2) == 0 and N // (block_n * 2) >= 2
               and block_n * 2 * per_image <= (2 << 20)):
            block_n *= 2
    assert N % block_n == 0, "block_n must divide N"

    kernel = functools.partial(_attention_gate_kernel,
                               nb=block_n, C=C, H=H, W=W, HWp=HWp)

    # VMEM budget: double-buffered in + out blocks, f32 working copy, the 7
    # pre-rolled stacked planes / masks / accumulators, plus slack.  Cap at
    # 48 MiB so there is headroom below v7x's 64 MiB physical VMEM.
    block_bytes = block_n * C * HWp * itemsize
    interm = 32 * block_n * HWp * 4 + block_n * C * HWp * 4
    vmem_limit = int(min(max(4 * block_bytes + interm + (4 << 20), 16 << 20), 48 << 20))
    # TODO(synk): for single-image C*HWp blocks > ~12 MiB add a C-tile grid
    # axis (running max/sum pass, then gate pass) so very large feature maps
    # fit v7x's 64 MiB VMEM instead of relying on one all-of-C-resident block.

    grid_spec = pltpu.PrefetchScalarGridSpec(
        num_scalar_prefetch=0,
        grid=(N // block_n,),
        in_specs=[
            pl.BlockSpec(memory_space=pltpu.SMEM),                    # folded params
            pl.BlockSpec((1, 2 * HWp), lambda n: (0, 0)),             # column index
            pl.BlockSpec((block_n, C, HWp), lambda n: (n, 0, 0)),     # x
        ],
        out_specs=pl.BlockSpec((block_n, C, HWp), lambda n: (n, 0, 0)),
    )

    out_flat = pl.pallas_call(
        kernel,
        out_shape=jax.ShapeDtypeStruct((N, C, HWp), x.dtype),
        grid_spec=grid_spec,
        compiler_params=pltpu.CompilerParams(
            dimension_semantics=("parallel",),
            vmem_limit_bytes=vmem_limit),
    )(params, colw2, x_flat)

    if HWp != HW:
        out_flat = out_flat[:, :, :HW]
    return out_flat.reshape(N, C, H, W)


def attention_gate_reference(x, conv_w, bn_params):
    """Plain-JAX reference for validation (un-folded BN, XLA conv)."""
    xf = x.astype(jnp.float32)
    cmax = jnp.max(xf, axis=1, keepdims=True)
    cmean = jnp.mean(xf, axis=1, keepdims=True)
    comp = jnp.concatenate([cmax, cmean], axis=1)                     # (N, 2, H, W)
    conv = jax.lax.conv_general_dilated(
        comp, conv_w.astype(jnp.float32), window_strides=(1, 1),
        padding=((PAD, PAD), (PAD, PAD)),
        dimension_numbers=("NCHW", "OIHW", "NCHW"))
    gamma, beta, mu, var = bn_params
    y = (conv - mu) * gamma * jax.lax.rsqrt(var + BN_EPS) + beta
    return (xf * jax.nn.sigmoid(y)).astype(x.dtype)


if __name__ == "__main__":
    key = jax.random.PRNGKey(0)
    kx1, kx2, kw = jax.random.split(key, 3)

    # Deterministic parameter init (Conv2d 2->1, 7x7, no bias; BN defaults).
    conv_w = (jax.random.normal(kw, (1, 2, K, K), dtype=jnp.float32) * 0.1)
    bn_params = jnp.array([1.0, 0.0, 0.0, 1.0], dtype=jnp.float32)  # gamma, beta, mean, var

    # Case 1: easy layout path (H*W multiple of 128, power-of-2 W).
    N, C, H, W = 2, 4, 16, 16
    x1 = jax.random.normal(kx1, (N, C, H, W), dtype=jnp.float32)
    out1 = jax.block_until_ready(attention_gate(x1, conv_w, bn_params))
    ref1 = attention_gate_reference(x1, conv_w, bn_params)
    assert out1.shape == (N, C, H, W)
    assert jnp.allclose(out1, ref1, atol=1e-5, rtol=1e-5), "mismatch vs reference (16x16)"

    # Case 2: non-power-of-2 W and H*W not a multiple of 128 (padded-lane path).
    N2, C2, H2, W2 = 2, 3, 14, 14
    x2 = jax.random.normal(kx2, (N2, C2, H2, W2), dtype=jnp.float32)
    out2 = jax.block_until_ready(attention_gate(x2, conv_w, bn_params))
    ref2 = attention_gate_reference(x2, conv_w, bn_params)
    assert out2.shape == (N2, C2, H2, W2)
    assert jnp.allclose(out2, ref2, atol=1e-5, rtol=1e-5), "mismatch vs reference (14x14)"

    print("KERNEL_OK")
</pallas_src>

<mosaic_0001>
module attributes {stable_mosaic.version = 11 : i64} {
  func.func @_attention_gate_kernel(%arg0: i32, %arg1: memref<99xf32, #tpu.memory_space<smem>>, %arg2: memref<1x512xi32, #tpu.memory_space<vmem>>, %arg3: memref<1x4x256xf32, #tpu.memory_space<vmem>>, %arg4: memref<1x4x256xf32, #tpu.memory_space<vmem>>) attributes {dimension_semantics = [#tpu.dimension_semantics<parallel>], iteration_bounds = array<i64: 2>, scalar_prefetch = 0 : i64, scratch_operands = 0 : i64, tpu.core_type = #tpu.core_type<tc>, window_params = [{transform_indices = @transform_0, window_bounds = array<i64: 99>}, {pipeline_mode = #tpu.pipeline_mode<synchronous>, transform_indices = @transform_1, window_bounds = array<i64: 1, 512>}, {transform_indices = @transform_2, window_bounds = array<i64: 1, 4, 256>}, {transform_indices = @transform_3, window_bounds = array<i64: 1, 4, 256>}]} {
    %c0 = arith.constant 0 : index
    %c0_0 = arith.constant 0 : index
    %c0_1 = arith.constant 0 : index
    %0 = vector.load %arg3[%c0, %c0_0, %c0_1] : memref<1x4x256xf32, #tpu.memory_space<vmem>>, vector<1x4x256xf32>
    %cst = arith.constant dense<0xFF800000> : vector<1x256xf32>
    %1 = vector.multi_reduction <maximumf>, %0, %cst [1] : vector<1x4x256xf32> to vector<1x256xf32>
    %cst_2 = arith.constant dense<0.000000e+00> : vector<1x256xf32>
    %2 = vector.multi_reduction <add>, %0, %cst_2 [1] : vector<1x4x256xf32> to vector<1x256xf32>
    %cst_3 = arith.constant 2.500000e-01 : f32
    %3 = vector.broadcast %cst_3 : f32 to vector<1x256xf32>
    %4 = arith.mulf %2, %3 : vector<1x256xf32>
    %5 = tpu.concatenate %1, %4 in 1 : vector<1x256xf32>, vector<1x256xf32> -> vector<1x512xf32>
    %c0_4 = arith.constant 0 : index
    %c0_5 = arith.constant 0 : index
    %6 = vector.load %arg2[%c0_4, %c0_5] : memref<1x512xi32, #tpu.memory_space<vmem>>, vector<1x512xi32>
    %c3_i32 = arith.constant 3 : i32
    %7 = tpu.dynamic_rotate %5 by %c3_i32 dim 1 : vector<1x512xf32>, i32 -> vector<1x512xf32>
    %c3_i32_6 = arith.constant 3 : i32
    %8 = vector.broadcast %c3_i32_6 : i32 to vector<1x512xi32>
    %9 = arith.cmpi sge, %6, %8 : vector<1x512xi32>
    %c19_i32 = arith.constant 19 : i32
    %10 = vector.broadcast %c19_i32 : i32 to vector<1x512xi32>
    %11 = arith.cmpi slt, %6, %10 : vector<1x512xi32>
    %12 = arith.andi %9, %11 : vector<1x512xi1>
    %cst_7 = arith.constant 0.000000e+00 : f32
    %13 = vector.broadcast %cst_7 : f32 to vector<1x512xf32>
    %14 = arith.select %12, %7, %13 : vector<1x512xi1>, vector<1x512xf32>
    %c2_i32 = arith.constant 2 : i32
    %15 = tpu.dynamic_rotate %5 by %c2_i32 dim 1 : vector<1x512xf32>, i32 -> vector<1x512xf32>
    %c2_i32_8 = arith.constant 2 : i32
    %16 = vector.broadcast %c2_i32_8 : i32 to vector<1x512xi32>
    %17 = arith.cmpi sge, %6, %16 : vector<1x512xi32>
    %c18_i32 = arith.constant 18 : i32
    %18 = vector.broadcast %c18_i32 : i32 to vector<1x512xi32>
    %19 = arith.cmpi slt, %6, %18 : vector<1x512xi32>
    %20 = arith.andi %17, %19 : vector<1x512xi1>
    %cst_9 = arith.constant 0.000000e+00 : f32
    %21 = vector.broadcast %cst_9 : f32 to vector<1x512xf32>
    %22 = arith.select %20, %15, %21 : vector<1x512xi1>, vector<1x512xf32>
    %c1_i32 = arith.constant 1 : i32
    %23 = tpu.dynamic_rotate %5 by %c1_i32 dim 1 : vector<1x512xf32>, i32 -> vector<1x512xf32>
    %c1_i32_10 = arith.constant 1 : i32
    %24 = vector.broadcast %c1_i32_10 : i32 to vector<1x512xi32>
    %25 = arith.cmpi sge, %6, %24 : vector<1x512xi32>
    %c17_i32 = arith.constant 17 : i32
    %26 = vector.broadcast %c17_i32 : i32 to vector<1x512xi32>
    %27 = arith.cmpi slt, %6, %26 : vector<1x512xi32>
    %28 = arith.andi %25, %27 : vector<1x512xi1>
    %cst_11 = arith.constant 0.000000e+00 : f32
    %29 = vector.broadcast %cst_11 : f32 to vector<1x512xf32>
    %30 = arith.select %28, %23, %29 : vector<1x512xi1>, vector<1x512xf32>
    %c511_i32 = arith.constant 511 : i32
    %31 = tpu.dynamic_rotate %5 by %c511_i32 dim 1 : vector<1x512xf32>, i32 -> vector<1x512xf32>
    %c-1_i32 = arith.constant -1 : i32
    %32 = vector.broadcast %c-1_i32 : i32 to vector<1x512xi32>
    %33 = arith.cmpi sge, %6, %32 : vector<1x512xi32>
    %c15_i32 = arith.constant 15 : i32
    %34 = vector.broadcast %c15_i32 : i32 to vector<1x512xi32>
    %35 = arith.cmpi slt, %6, %34 : vector<1x512xi32>
    %36 = arith.andi %33, %35 : vector<1x512xi1>
    %cst_12 = arith.constant 0.000000e+00 : f32
    %37 = vector.broadcast %cst_12 : f32 to vector<1x512xf32>
    %38 = arith.select %36, %31, %37 : vector<1x512xi1>, vector<1x512xf32>
    %c510_i32 = arith.constant 510 : i32
    %39 = tpu.dynamic_rotate %5 by %c510_i32 dim 1 : vector<1x512xf32>, i32 -> vector<1x512xf32>
    %c-2_i32 = arith.constant -2 : i32
    %40 = vector.broadcast %c-2_i32 : i32 to vector<1x512xi32>
    %41 = arith.cmpi sge, %6, %40 : vector<1x512xi32>
    %c14_i32 = arith.constant 14 : i32
    %42 = vector.broadcast %c14_i32 : i32 to vector<1x512xi32>
    %43 = arith.cmpi slt, %6, %42 : vector<1x512xi32>
    %44 = arith.andi %41, %43 : vector<1x512xi1>
    %cst_13 = arith.constant 0.000000e+00 : f32
    %45 = vector.broadcast %cst_13 : f32 to vector<1x512xf32>
    %46 = arith.select %44, %39, %45 : vector<1x512xi1>, vector<1x512xf32>
    %c509_i32 = arith.constant 509 : i32
    %47 = tpu.dynamic_rotate %5 by %c509_i32 dim 1 : vector<1x512xf32>, i32 -> vector<1x512xf32>
    %c-3_i32 = arith.constant -3 : i32
    %48 = vector.broadcast %c-3_i32 : i32 to vector<1x512xi32>
    %49 = arith.cmpi sge, %6, %48 : vector<1x512xi32>
    %c13_i32 = arith.constant 13 : i32
    %50 = vector.broadcast %c13_i32 : i32 to vector<1x512xi32>
    %51 = arith.cmpi slt, %6, %50 : vector<1x512xi32>
    %52 = arith.andi %49, %51 : vector<1x512xi1>
    %cst_14 = arith.constant 0.000000e+00 : f32
    %53 = vector.broadcast %cst_14 : f32 to vector<1x512xf32>
    %54 = arith.select %52, %47, %53 : vector<1x512xi1>, vector<1x512xf32>
    %55 = tpu.iota {dimensions = array<i32: 1>} : vector<1x256xi32>
    %cst_15 = arith.constant 0.000000e+00 : f32
    %56 = vector.broadcast %cst_15 : f32 to vector<1x256xf32>
    %cst_16 = arith.constant 0.000000e+00 : f32
    %57 = vector.broadcast %cst_16 : f32 to vector<1x256xf32>
    %cst_17 = arith.constant 0.000000e+00 : f32
    %58 = vector.broadcast %cst_17 : f32 to vector<1x256xf32>
    %cst_18 = arith.constant 0.000000e+00 : f32
    %59 = vector.broadcast %cst_18 : f32 to vector<1x256xf32>
    %c0_19 = arith.constant 0 : index
    %60 = memref.load %arg1[%c0_19] : memref<99xf32, #tpu.memory_space<smem>>
    %c49 = arith.constant 49 : index
    %61 = memref.load %arg1[%c49] : memref<99xf32, #tpu.memory_space<smem>>
    %62 = vector.extract_strided_slice %14 {offsets = [0, 0], sizes = [1, 256], strides = [1, 1]} : vector<1x512xf32> to vector<1x256xf32>
    %63 = vector.broadcast %60 : f32 to vector<1x256xf32>
    %64 = arith.mulf %63, %62 : vector<1x256xf32>
    %65 = vector.extract_strided_slice %14 {offsets = [0, 256], sizes = [1, 256], strides = [1, 1]} : vector<1x512xf32> to vector<1x256xf32>
    %66 = vector.broadcast %61 : f32 to vector<1x256xf32>
    %67 = arith.mulf %66, %65 : vector<1x256xf32>
    %68 = arith.addf %64, %67 : vector<1x256xf32>
    %69 = arith.addf %58, %68 : vector<1x256xf32>
    %c1 = arith.constant 1 : index
    %70 = memref.load %arg1[%c1] : memref<99xf32, #tpu.memory_space<smem>>
    %c50 = arith.constant 50 : index
    %71 = memref.load %arg1[%c50] : memref<99xf32, #tpu.memory_space<smem>>
    %72 = vector.extract_strided_slice %22 {offsets = [0, 0], sizes = [1, 256], strides = [1, 1]} : vector<1x512xf32> to vector<1x256xf32>
    %73 = vector.broadcast %70 : f32 to vector<1x256xf32>
    %74 = arith.mulf %73, %72 : vector<1x256xf32>
    %75 = vector.extract_strided_slice %22 {offsets = [0, 256], sizes = [1, 256], strides = [1, 1]} : vector<1x512xf32> to vector<1x256xf32>
    %76 = vector.broadcast %71 : f32 to vector<1x256xf32>
    %77 = arith.mulf %76, %75 : vector<1x256xf32>
    %78 = arith.addf %74, %77 : vector<1x256xf32>
    %79 = arith.addf %59, %78 : vector<1x256xf32>
    %c2 = arith.constant 2 : index
    %80 = memref.load %arg1[%c2] : memref<99xf32, #tpu.memory_space<smem>>
    %c51 = arith.constant 51 : index
    %81 = memref.load %arg1[%c51] : memref<99xf32, #tpu.memory_space<smem>>
    %82 = vector.extract_strided_slice %30 {offsets = [0, 0], sizes = [1, 256], strides = [1, 1]} : vector<1x512xf32> to vector<1x256xf32>
    %83 = vector.broadcast %80 : f32 to vector<1x256xf32>
    %84 = arith.mulf %83, %82 : vector<1x256xf32>
    %85 = vector.extract_strided_slice %30 {offsets = [0, 256], sizes = [1, 256], strides = [1, 1]} : vector<1x512xf32> to vector<1x256xf32>
    %86 = vector.broadcast %81 : f32 to vector<1x256xf32>
    %87 = arith.mulf %86, %85 : vector<1x256xf32>
    %88 = arith.addf %84, %87 : vector<1x256xf32>
    %89 = arith.addf %69, %88 : vector<1x256xf32>
    %c3 = arith.constant 3 : index
    %90 = memref.load %arg1[%c3] : memref<99xf32, #tpu.memory_space<smem>>
    %c52 = arith.constant 52 : index
    %91 = memref.load %arg1[%c52] : memref<99xf32, #tpu.memory_space<smem>>
    %92 = vector.extract_strided_slice %5 {offsets = [0, 0], sizes = [1, 256], strides = [1, 1]} : vector<1x512xf32> to vector<1x256xf32>
    %93 = vector.broadcast %90 : f32 to vector<1x256xf32>
    %94 = arith.mulf %93, %92 : vector<1x256xf32>
    %95 = vector.extract_strided_slice %5 {offsets = [0, 256], sizes = [1, 256], strides = [1, 1]} : vector<1x512xf32> to vector<1x256xf32>
    %96 = vector.broadcast %91 : f32 to vector<1x256xf32>
    %97 = arith.mulf %96, %95 : vector<1x256xf32>
    %98 = arith.addf %94, %97 : vector<1x256xf32>
    %99 = arith.addf %79, %98 : vector<1x256xf32>
    %c4 = arith.constant 4 : index
    %100 = memref.load %arg1[%c4] : memref<99xf32, #tpu.memory_space<smem>>
    %c53 = arith.constant 53 : index
    %101 = memref.load %arg1[%c53] : memref<99xf32, #tpu.memory_space<smem>>
    %102 = vector.extract_strided_slice %38 {offsets = [0, 0], sizes = [1, 256], strides = [1, 1]} : vector<1x512xf32> to vector<1x256xf32>
    %103 = vector.broadcast %100 : f32 to vector<1x256xf32>
    %104 = arith.mulf %103, %102 : vector<1x256xf32>
    %105 = vector.extract_strided_slice %38 {offsets = [0, 256], sizes = [1, 256], strides = [1, 1]} : vector<1x512xf32> to vector<1x256xf32>
    %106 = vector.broadcast %101 : f32 to vector<1x256xf32>
    %107 = arith.mulf %106, %105 : vector<1x256xf32>
    %108 = arith.addf %104, %107 : vector<1x256xf32>
    %109 = arith.addf %89, %108 : vector<1x256xf32>
    %c5 = arith.constant 5 : index
    %110 = memref.load %arg1[%c5] : memref<99xf32, #tpu.memory_space<smem>>
    %c54 = arith.constant 54 : index
    %111 = memref.load %arg1[%c54] : memref<99xf32, #tpu.memory_space<smem>>
    %112 = vector.extract_strided_slice %46 {offsets = [0, 0], sizes = [1, 256], strides = [1, 1]} : vector<1x512xf32> to vector<1x256xf32>
    %113 = vector.broadcast %110 : f32 to vector<1x256xf32>
    %114 = arith.mulf %113, %112 : vector<1x256xf32>
    %115 = vector.extract_strided_slice %46 {offsets = [0, 256], sizes = [1, 256], strides = [1, 1]} : vector<1x512xf32> to vector<1x256xf32>
    %116 = vector.broadcast %111 : f32 to vector<1x256xf32>
    %117 = arith.mulf %116, %115 : vector<1x256xf32>
    %118 = arith.addf %114, %117 : vector<1x256xf32>
    %119 = arith.addf %99, %118 : vector<1x256xf32>
    %c6 = arith.constant 6 : index
    %120 = memref.load %arg1[%c6] : memref<99xf32, #tpu.memory_space<smem>>
    %c55 = arith.constant 55 : index
    %121 = memref.load %arg1[%c55] : memref<99xf32, #tpu.memory_space<smem>>
    %122 = vector.extract_strided_slice %54 {offsets = [0, 0], sizes = [1, 256], strides = [1, 1]} : vector<1x512xf32> to vector<1x256xf32>
    %123 = vector.broadcast %120 : f32 to vector<1x256xf32>
    %124 = arith.mulf %123, %122 : vector<1x256xf32>
    %125 = vector.extract_strided_slice %54 {offsets = [0, 256], sizes = [1, 256], strides = [1, 1]} : vector<1x512xf32> to vector<1x256xf32>
    %126 = vector.broadcast %121 : f32 to vector<1x256xf32>
    %127 = arith.mulf %126, %125 : vector<1x256xf32>
    %128 = arith.addf %124, %127 : vector<1x256xf32>
    %129 = arith.addf %109, %128 : vector<1x256xf32>
    %130 = arith.addf %129, %119 : vector<1x256xf32>
    %c48_i32 = arith.constant 48 : i32
    %131 = tpu.dynamic_rotate %130 by %c48_i32 dim 1 : vector<1x256xf32>, i32 -> vector<1x256xf32>
    %c48_i32_20 = arith.constant 48 : i32
    %132 = vector.broadcast %c48_i32_20 : i32 to vector<1x256xi32>
    %133 = arith.cmpi sge, %55, %132 : vector<1x256xi32>
    %c256_i32 = arith.constant 256 : i32
    %134 = vector.broadcast %c256_i32 : i32 to vector<1x256xi32>
    %135 = arith.cmpi slt, %55, %134 : vector<1x256xi32>
    %136 = arith.andi %133, %135 : vector<1x256xi1>
    %cst_21 = arith.constant 0.000000e+00 : f32
    %137 = vector.broadcast %cst_21 : f32 to vector<1x256xf32>
    %138 = arith.select %136, %131, %137 : vector<1x256xi1>, vector<1x256xf32>
    %139 = arith.addf %56, %138 : vector<1x256xf32>
    %cst_22 = arith.constant 0.000000e+00 : f32
    %140 = vector.broadcast %cst_22 : f32 to vector<1x256xf32>
    %cst_23 = arith.constant 0.000000e+00 : f32
    %141 = vector.broadcast %cst_23 : f32 to vector<1x256xf32>
    %c7 = arith.constant 7 : index
    %142 = memref.load %arg1[%c7] : memref<99xf32, #tpu.memory_space<smem>>
    %c56 = arith.constant 56 : index
    %143 = memref.load %arg1[%c56] : memref<99xf32, #tpu.memory_space<smem>>
    %144 = vector.extract_strided_slice %14 {offsets = [0, 0], sizes = [1, 256], strides = [1, 1]} : vector<1x512xf32> to vector<1x256xf32>
    %145 = vector.broadcast %142 : f32 to vector<1x256xf32>
    %146 = arith.mulf %145, %144 : vector<1x256xf32>
    %147 = vector.extract_strided_slice %14 {offsets = [0, 256], sizes = [1, 256], strides = [1, 1]} : vector<1x512xf32> to vector<1x256xf32>
    %148 = vector.broadcast %143 : f32 to vector<1x256xf32>
    %149 = arith.mulf %148, %147 : vector<1x256xf32>
    %150 = arith.addf %146, %149 : vector<1x256xf32>
    %151 = arith.addf %140, %150 : vector<1x256xf32>
    %c8 = arith.constant 8 : index
    %152 = memref.load %arg1[%c8] : memref<99xf32, #tpu.memory_space<smem>>
    %c57 = arith.constant 57 : index
    %153 = memref.load %arg1[%c57] : memref<99xf32, #tpu.memory_space<smem>>
    %154 = vector.extract_strided_slice %22 {offsets = [0, 0], sizes = [1, 256], strides = [1, 1]} : vector<1x512xf32> to vector<1x256xf32>
    %155 = vector.broadcast %152 : f32 to vector<1x256xf32>
    %156 = arith.mulf %155, %154 : vector<1x256xf32>
    %157 = vector.extract_strided_slice %22 {offsets = [0, 256], sizes = [1, 256], strides = [1, 1]} : vector<1x512xf32> to vector<1x256xf32>
    %158 = vector.broadcast %153 : f32 to vector<1x256xf32>
    %159 = arith.mulf %158, %157 : vector<1x256xf32>
    %160 = arith.addf %156, %159 : vector<1x256xf32>
    %161 = arith.addf %141, %160 : vector<1x256xf32>
    %c9 = arith.constant 9 : index
    %162 = memref.load %arg1[%c9] : memref<99xf32, #tpu.memory_space<smem>>
    %c58 = arith.constant 58 : index
    %163 = memref.load %arg1[%c58] : memref<99xf32, #tpu.memory_space<smem>>
    %164 = vector.extract_strided_slice %30 {offsets = [0, 0], sizes = [1, 256], strides = [1, 1]} : vector<1x512xf32> to vector<1x256xf32>
    %165 = vector.broadcast %162 : f32 to vector<1x256xf32>
    %166 = arith.mulf %165, %164 : vector<1x256xf32>
    %167 = vector.extract_strided_slice %30 {offsets = [0, 256], sizes = [1, 256], strides = [1, 1]} : vector<1x512xf32> to vector<1x256xf32>
    %168 = vector.broadcast %163 : f32 to vector<1x256xf32>
    %169 = arith.mulf %168, %167 : vector<1x256xf32>
    %170 = arith.addf %166, %169 : vector<1x256xf32>
    %171 = arith.addf %151, %170 : vector<1x256xf32>
    %c10 = arith.constant 10 : index
    %172 = memref.load %arg1[%c10] : memref<99xf32, #tpu.memory_space<smem>>
    %c59 = arith.constant 59 : index
    %173 = memref.load %arg1[%c59] : memref<99xf32, #tpu.memory_space<smem>>
    %174 = vector.extract_strided_slice %5 {offsets = [0, 0], sizes = [1, 256], strides = [1, 1]} : vector<1x512xf32> to vector<1x256xf32>
    %175 = vector.broadcast %172 : f32 to vector<1x256xf32>
    %176 = arith.mulf %175, %174 : vector<1x256xf32>
    %177 = vector.extract_strided_slice %5 {offsets = [0, 256], sizes = [1, 256], strides = [1, 1]} : vector<1x512xf32> to vector<1x256xf32>
    %178 = vector.broadcast %173 : f32 to vector<1x256xf32>
    %179 = arith.mulf %178, %177 : vector<1x256xf32>
    %180 = arith.addf %176, %179 : vector<1x256xf32>
    %181 = arith.addf %161, %180 : vector<1x256xf32>
    %c11 = arith.constant 11 : index
    %182 = memref.load %arg1[%c11] : memref<99xf32, #tpu.memory_space<smem>>
    %c60 = arith.constant 60 : index
    %183 = memref.load %arg1[%c60] : memref<99xf32, #tpu.memory_space<smem>>
    %184 = vector.extract_strided_slice %38 {offsets = [0, 0], sizes = [1, 256], strides = [1, 1]} : vector<1x512xf32> to vector<1x256xf32>
    %185 = vector.broadcast %182 : f32 to vector<1x256xf32>
    %186 = arith.mulf %185, %184 : vector<1x256xf32>
    %187 = vector.extract_strided_slice %38 {offsets = [0, 256], sizes = [1, 256], strides = [1, 1]} : vector<1x512xf32> to vector<1x256xf32>
    %188 = vector.broadcast %183 : f32 to vector<1x256xf32>
    %189 = arith.mulf %188, %187 : vector<1x256xf32>
    %190 = arith.addf %186, %189 : vector<1x256xf32>
    %191 = arith.addf %171, %190 : vector<1x256xf32>
    %c12 = arith.constant 12 : index
    %192 = memref.load %arg1[%c12] : memref<99xf32, #tpu.memory_space<smem>>
    %c61 = arith.constant 61 : index
    %193 = memref.load %arg1[%c61] : memref<99xf32, #tpu.memory_space<smem>>
    %194 = vector.extract_strided_slice %46 {offsets = [0, 0], sizes = [1, 256], strides = [1, 1]} : vector<1x512xf32> to vector<1x256xf32>
    %195 = vector.broadcast %192 : f32 to vector<1x256xf32>
    %196 = arith.mulf %195, %194 : vector<1x256xf32>
    %197 = vector.extract_strided_slice %46 {offsets = [0, 256], sizes = [1, 256], strides = [1, 1]} : vector<1x512xf32> to vector<1x256xf32>
    %198 = vector.broadcast %193 : f32 to vector<1x256xf32>
    %199 = arith.mulf %198, %197 : vector<1x256xf32>
    %200 = arith.addf %196, %199 : vector<1x256xf32>
    %201 = arith.addf %181, %200 : vector<1x256xf32>
    %c13 = arith.constant 13 : index
    %202 = memref.load %arg1[%c13] : memref<99xf32, #tpu.memory_space<smem>>
    %c62 = arith.constant 62 : index
    %203 = memref.load %arg1[%c62] : memref<99xf32, #tpu.memory_space<smem>>
    %204 = vector.extract_strided_slice %54 {offsets = [0, 0], sizes = [1, 256], strides = [1, 1]} : vector<1x512xf32> to vector<1x256xf32>
    %205 = vector.broadcast %202 : f32 to vector<1x256xf32>
    %206 = arith.mulf %205, %204 : vector<1x256xf32>
    %207 = vector.extract_strided_slice %54 {offsets = [0, 256], sizes = [1, 256], strides = [1, 1]} : vector<1x512xf32> to vector<1x256xf32>
    %208 = vector.broadcast %203 : f32 to vector<1x256xf32>
    %209 = arith.mulf %208, %207 : vector<1x256xf32>
    %210 = arith.addf %206, %209 : vector<1x256xf32>
    %211 = arith.addf %191, %210 : vector<1x256xf32>
    %212 = arith.addf %211, %201 : vector<1x256xf32>
    %c32_i32 = arith.constant 32 : i32
    %213 = tpu.dynamic_rotate %212 by %c32_i32 dim 1 : vector<1x256xf32>, i32 -> vector<1x256xf32>
    %c32_i32_24 = arith.constant 32 : i32
    %214 = vector.broadcast %c32_i32_24 : i32 to vector<1x256xi32>
    %215 = arith.cmpi sge, %55, %214 : vector<1x256xi32>
    %c256_i32_25 = arith.constant 256 : i32
    %216 = vector.broadcast %c256_i32_25 : i32 to vector<1x256xi32>
    %217 = arith.cmpi slt, %55, %216 : vector<1x256xi32>
    %218 = arith.andi %215, %217 : vector<1x256xi1>
    %cst_26 = arith.constant 0.000000e+00 : f32
    %219 = vector.broadcast %cst_26 : f32 to vector<1x256xf32>
    %220 = arith.select %218, %213, %219 : vector<1x256xi1>, vector<1x256xf32>
    %221 = arith.addf %57, %220 : vector<1x256xf32>
    %cst_27 = arith.constant 0.000000e+00 : f32
    %222 = vector.broadcast %cst_27 : f32 to vector<1x256xf32>
    %cst_28 = arith.constant 0.000000e+00 : f32
    %223 = vector.broadcast %cst_28 : f32 to vector<1x256xf32>
    %c14 = arith.constant 14 : index
    %224 = memref.load %arg1[%c14] : memref<99xf32, #tpu.memory_space<smem>>
    %c63 = arith.constant 63 : index
    %225 = memref.load %arg1[%c63] : memref<99xf32, #tpu.memory_space<smem>>
    %226 = vector.extract_strided_slice %14 {offsets = [0, 0], sizes = [1, 256], strides = [1, 1]} : vector<1x512xf32> to vector<1x256xf32>
    %227 = vector.broadcast %224 : f32 to vector<1x256xf32>
    %228 = arith.mulf %227, %226 : vector<1x256xf32>
    %229 = vector.extract_strided_slice %14 {offsets = [0, 256], sizes = [1, 256], strides = [1, 1]} : vector<1x512xf32> to vector<1x256xf32>
    %230 = vector.broadcast %225 : f32 to vector<1x256xf32>
    %231 = arith.mulf %230, %229 : vector<1x256xf32>
    %232 = arith.addf %228, %231 : vector<1x256xf32>
    %233 = arith.addf %222, %232 : vector<1x256xf32>
    %c15 = arith.constant 15 : index
    %234 = memref.load %arg1[%c15] : memref<99xf32, #tpu.memory_space<smem>>
    %c64 = arith.constant 64 : index
    %235 = memref.load %arg1[%c64] : memref<99xf32, #tpu.memory_space<smem>>
    %236 = vector.extract_strided_slice %22 {offsets = [0, 0], sizes = [1, 256], strides = [1, 1]} : vector<1x512xf32> to vector<1x256xf32>
    %237 = vector.broadcast %234 : f32 to vector<1x256xf32>
    %238 = arith.mulf %237, %236 : vector<1x256xf32>
    %239 = vector.extract_strided_slice %22 {offsets = [0, 256], sizes = [1, 256], strides = [1, 1]} : vector<1x512xf32> to vector<1x256xf32>
    %240 = vector.broadcast %235 : f32 to vector<1x256xf32>
    %241 = arith.mulf %240, %239 : vector<1x256xf32>
    %242 = arith.addf %238, %241 : vector<1x256xf32>
    %243 = arith.addf %223, %242 : vector<1x256xf32>
    %c16 = arith.constant 16 : index
    %244 = memref.load %arg1[%c16] : memref<99xf32, #tpu.memory_space<smem>>
    %c65 = arith.constant 65 : index
    %245 = memref.load %arg1[%c65] : memref<99xf32, #tpu.memory_space<smem>>
    %246 = vector.extract_strided_slice %30 {offsets = [0, 0], sizes = [1, 256], strides = [1, 1]} : vector<1x512xf32> to vector<1x256xf32>
    %247 = vector.broadcast %244 : f32 to vector<1x256xf32>
    %248 = arith.mulf %247, %246 : vector<1x256xf32>
    %249 = vector.extract_strided_slice %30 {offsets = [0, 256], sizes = [1, 256], strides = [1, 1]} : vector<1x512xf32> to vector<1x256xf32>
    %250 = vector.broadcast %245 : f32 to vector<1x256xf32>
    %251 = arith.mulf %250, %249 : vector<1x256xf32>
    %252 = arith.addf %248, %251 : vector<1x256xf32>
    %253 = arith.addf %233, %252 : vector<1x256xf32>
    %c17 = arith.constant 17 : index
    %254 = memref.load %arg1[%c17] : memref<99xf32, #tpu.memory_space<smem>>
    %c66 = arith.constant 66 : index
    %255 = memref.load %arg1[%c66] : memref<99xf32, #tpu.memory_space<smem>>
    %256 = vector.extract_strided_slice %5 {offsets = [0, 0], sizes = [1, 256], strides = [1, 1]} : vector<1x512xf32> to vector<1x256xf32>
    %257 = vector.broadcast %254 : f32 to vector<1x256xf32>
    %258 = arith.mulf %257, %256 : vector<1x256xf32>
    %259 = vector.extract_strided_slice %5 {offsets = [0, 256], sizes = [1, 256], strides = [1, 1]} : vector<1x512xf32> to vector<1x256xf32>
    %260 = vector.broadcast %255 : f32 to vector<1x256xf32>
    %261 = arith.mulf %260, %259 : vector<1x256xf32>
    %262 = arith.addf %258, %261 : vector<1x256xf32>
    %263 = arith.addf %243, %262 : vector<1x256xf32>
    %c18 = arith.constant 18 : index
    %264 = memref.load %arg1[%c18] : memref<99xf32, #tpu.memory_space<smem>>
    %c67 = arith.constant 67 : index
    %265 = memref.load %arg1[%c67] : memref<99xf32, #tpu.memory_space<smem>>
    %266 = vector.extract_strided_slice %38 {offsets = [0, 0], sizes = [1, 256], strides = [1, 1]} : vector<1x512xf32> to vector<1x256xf32>
    %267 = vector.broadcast %264 : f32 to vector<1x256xf32>
    %268 = arith.mulf %267, %266 : vector<1x256xf32>
    %269 = vector.extract_strided_slice %38 {offsets = [0, 256], sizes = [1, 256], strides = [1, 1]} : vector<1x512xf32> to vector<1x256xf32>
    %270 = vector.broadcast %265 : f32 to vector<1x256xf32>
    %271 = arith.mulf %270, %269 : vector<1x256xf32>
    %272 = arith.addf %268, %271 : vector<1x256xf32>
    %273 = arith.addf %253, %272 : vector<1x256xf32>
    %c19 = arith.constant 19 : index
    %274 = memref.load %arg1[%c19] : memref<99xf32, #tpu.memory_space<smem>>
    %c68 = arith.constant 68 : index
    %275 = memref.load %arg1[%c68] : memref<99xf32, #tpu.memory_space<smem>>
    %276 = vector.extract_strided_slice %46 {offsets = [0, 0], sizes = [1, 256], strides = [1, 1]} : vector<1x512xf32> to vector<1x256xf32>
    %277 = vector.broadcast %274 : f32 to vector<1x256xf32>
    %278 = arith.mulf %277, %276 : vector<1x256xf32>
    %279 = vector.extract_strided_slice %46 {offsets = [0, 256], sizes = [1, 256], strides = [1, 1]} : vector<1x512xf32> to vector<1x256xf32>
    %280 = vector.broadcast %275 : f32 to vector<1x256xf32>
    %281 = arith.mulf %280, %279 : vector<1x256xf32>
    %282 = arith.addf %278, %281 : vector<1x256xf32>
    %283 = arith.addf %263, %282 : vector<1x256xf32>
    %c20 = arith.constant 20 : index
    %284 = memref.load %arg1[%c20] : memref<99xf32, #tpu.memory_space<smem>>
    %c69 = arith.constant 69 : index
    %285 = memref.load %arg1[%c69] : memref<99xf32, #tpu.memory_space<smem>>
    %286 = vector.extract_strided_slice %54 {offsets = [0, 0], sizes = [1, 256], strides = [1, 1]} : vector<1x512xf32> to vector<1x256xf32>
    %287 = vector.broadcast %284 : f32 to vector<1x256xf32>
    %288 = arith.mulf %287, %286 : vector<1x256xf32>
    %289 = vector.extract_strided_slice %54 {offsets = [0, 256], sizes = [1, 256], strides = [1, 1]} : vector<1x512xf32> to vector<1x256xf32>
    %290 = vector.broadcast %285 : f32 to vector<1x256xf32>
    %291 = arith.mulf %290, %289 : vector<1x256xf32>
    %292 = arith.addf %288, %291 : vector<1x256xf32>
    %293 = arith.addf %273, %292 : vector<1x256xf32>
    %294 = arith.addf %293, %283 : vector<1x256xf32>
    %c16_i32 = arith.constant 16 : i32
    %295 = tpu.dynamic_rotate %294 by %c16_i32 dim 1 : vector<1x256xf32>, i32 -> vector<1x256xf32>
    %c16_i32_29 = arith.constant 16 : i32
    %296 = vector.broadcast %c16_i32_29 : i32 to vector<1x256xi32>
    %297 = arith.cmpi sge, %55, %296 : vector<1x256xi32>
    %c256_i32_30 = arith.constant 256 : i32
    %298 = vector.broadcast %c256_i32_30 : i32 to vector<1x256xi32>
    %299 = arith.cmpi slt, %55, %298 : vector<1x256xi32>
    %300 = arith.andi %297, %299 : vector<1x256xi1>
    %cst_31 = arith.constant 0.000000e+00 : f32
    %301 = vector.broadcast %cst_31 : f32 to vector<1x256xf32>
    %302 = arith.select %300, %295, %301 : vector<1x256xi1>, vector<1x256xf32>
    %303 = arith.addf %139, %302 : vector<1x256xf32>
    %cst_32 = arith.constant 0.000000e+00 : f32
    %304 = vector.broadcast %cst_32 : f32 to vector<1x256xf32>
    %cst_33 = arith.constant 0.000000e+00 : f32
    %305 = vector.broadcast %cst_33 : f32 to vector<1x256xf32>
    %c21 = arith.constant 21 : index
    %306 = memref.load %arg1[%c21] : memref<99xf32, #tpu.memory_space<smem>>
    %c70 = arith.constant 70 : index
    %307 = memref.load %arg1[%c70] : memref<99xf32, #tpu.memory_space<smem>>
    %308 = vector.extract_strided_slice %14 {offsets = [0, 0], sizes = [1, 256], strides = [1, 1]} : vector<1x512xf32> to vector<1x256xf32>
    %309 = vector.broadcast %306 : f32 to vector<1x256xf32>
    %310 = arith.mulf %309, %308 : vector<1x256xf32>
    %311 = vector.extract_strided_slice %14 {offsets = [0, 256], sizes = [1, 256], strides = [1, 1]} : vector<1x512xf32> to vector<1x256xf32>
    %312 = vector.broadcast %307 : f32 to vector<1x256xf32>
    %313 = arith.mulf %312, %311 : vector<1x256xf32>
    %314 = arith.addf %310, %313 : vector<1x256xf32>
    %315 = arith.addf %304, %314 : vector<1x256xf32>
    %c22 = arith.constant 22 : index
    %316 = memref.load %arg1[%c22] : memref<99xf32, #tpu.memory_space<smem>>
    %c71 = arith.constant 71 : index
    %317 = memref.load %arg1[%c71] : memref<99xf32, #tpu.memory_space<smem>>
    %318 = vector.extract_strided_slice %22 {offsets = [0, 0], sizes = [1, 256], strides = [1, 1]} : vector<1x512xf32> to vector<1x256xf32>
    %319 = vector.broadcast %316 : f32 to vector<1x256xf32>
    %320 = arith.mulf %319, %318 : vector<1x256xf32>
    %321 = vector.extract_strided_slice %22 {offsets = [0, 256], sizes = [1, 256], strides = [1, 1]} : vector<1x512xf32> to vector<1x256xf32>
    %322 = vector.broadcast %317 : f32 to vector<1x256xf32>
    %323 = arith.mulf %322, %321 : vector<1x256xf32>
    %324 = arith.addf %320, %323 : vector<1x256xf32>
    %325 = arith.addf %305, %324 : vector<1x256xf32>
    %c23 = arith.constant 23 : index
    %326 = memref.load %arg1[%c23] : memref<99xf32, #tpu.memory_space<smem>>
    %c72 = arith.constant 72 : index
    %327 = memref.load %arg1[%c72] : memref<99xf32, #tpu.memory_space<smem>>
    %328 = vector.extract_strided_slice %30 {offsets = [0, 0], sizes = [1, 256], strides = [1, 1]} : vector<1x512xf32> to vector<1x256xf32>
    %329 = vector.broadcast %326 : f32 to vector<1x256xf32>
    %330 = arith.mulf %329, %328 : vector<1x256xf32>
    %331 = vector.extract_strided_slice %30 {offsets = [0, 256], sizes = [1, 256], strides = [1, 1]} : vector<1x512xf32> to vector<1x256xf32>
    %332 = vector.broadcast %327 : f32 to vector<1x256xf32>
    %333 = arith.mulf %332, %331 : vector<1x256xf32>
    %334 = arith.addf %330, %333 : vector<1x256xf32>
    %335 = arith.addf %315, %334 : vector<1x256xf32>
    %c24 = arith.constant 24 : index
    %336 = memref.load %arg1[%c24] : memref<99xf32, #tpu.memory_space<smem>>
    %c73 = arith.constant 73 : index
    %337 = memref.load %arg1[%c73] : memref<99xf32, #tpu.memory_space<smem>>
    %338 = vector.extract_strided_slice %5 {offsets = [0, 0], sizes = [1, 256], strides = [1, 1]} : vector<1x512xf32> to vector<1x256xf32>
    %339 = vector.broadcast %336 : f32 to vector<1x256xf32>
    %340 = arith.mulf %339, %338 : vector<1x256xf32>
    %341 = vector.extract_strided_slice %5 {offsets = [0, 256], sizes = [1, 256], strides = [1, 1]} : vector<1x512xf32> to vector<1x256xf32>
    %342 = vector.broadcast %337 : f32 to vector<1x256xf32>
    %343 = arith.mulf %342, %341 : vector<1x256xf32>
    %344 = arith.addf %340, %343 : vector<1x256xf32>
    %345 = arith.addf %325, %344 : vector<1x256xf32>
    %c25 = arith.constant 25 : index
    %346 = memref.load %arg1[%c25] : memref<99xf32, #tpu.memory_space<smem>>
    %c74 = arith.constant 74 : index
    %347 = memref.load %arg1[%c74] : memref<99xf32, #tpu.memory_space<smem>>
    %348 = vector.extract_strided_slice %38 {offsets = [0, 0], sizes = [1, 256], strides = [1, 1]} : vector<1x512xf32> to vector<1x256xf32>
    %349 = vector.broadcast %346 : f32 to vector<1x256xf32>
    %350 = arith.mulf %349, %348 : vector<1x256xf32>
    %351 = vector.extract_strided_slice %38 {offsets = [0, 256], sizes = [1, 256], strides = [1, 1]} : vector<1x512xf32> to vector<1x256xf32>
    %352 = vector.broadcast %347 : f32 to vector<1x256xf32>
    %353 = arith.mulf %352, %351 : vector<1x256xf32>
    %354 = arith.addf %350, %353 : vector<1x256xf32>
    %355 = arith.addf %335, %354 : vector<1x256xf32>
    %c26 = arith.constant 26 : index
    %356 = memref.load %arg1[%c26] : memref<99xf32, #tpu.memory_space<smem>>
    %c75 = arith.constant 75 : index
    %357 = memref.load %arg1[%c75] : memref<99xf32, #tpu.memory_space<smem>>
    %358 = vector.extract_strided_slice %46 {offsets = [0, 0], sizes = [1, 256], strides = [1, 1]} : vector<1x512xf32> to vector<1x256xf32>
    %359 = vector.broadcast %356 : f32 to vector<1x256xf32>
    %360 = arith.mulf %359, %358 : vector<1x256xf32>
    %361 = vector.extract_strided_slice %46 {offsets = [0, 256], sizes = [1, 256], strides = [1, 1]} : vector<1x512xf32> to vector<1x256xf32>
    %362 = vector.broadcast %357 : f32 to vector<1x256xf32>
    %363 = arith.mulf %362, %361 : vector<1x256xf32>
    %364 = arith.addf %360, %363 : vector<1x256xf32>
    %365 = arith.addf %345, %364 : vector<1x256xf32>
    %c27 = arith.constant 27 : index
    %366 = memref.load %arg1[%c27] : memref<99xf32, #tpu.memory_space<smem>>
    %c76 = arith.constant 76 : index
    %367 = memref.load %arg1[%c76] : memref<99xf32, #tpu.memory_space<smem>>
    %368 = vector.extract_strided_slice %54 {offsets = [0, 0], sizes = [1, 256], strides = [1, 1]} : vector<1x512xf32> to vector<1x256xf32>
    %369 = vector.broadcast %366 : f32 to vector<1x256xf32>
    %370 = arith.mulf %369, %368 : vector<1x256xf32>
    %371 = vector.extract_strided_slice %54 {offsets = [0, 256], sizes = [1, 256], strides = [1, 1]} : vector<1x512xf32> to vector<1x256xf32>
    %372 = vector.broadcast %367 : f32 to vector<1x256xf32>
    %373 = arith.mulf %372, %371 : vector<1x256xf32>
    %374 = arith.addf %370, %373 : vector<1x256xf32>
    %375 = arith.addf %355, %374 : vector<1x256xf32>
    %376 = arith.addf %375, %365 : vector<1x256xf32>
    %377 = arith.addf %221, %376 : vector<1x256xf32>
    %cst_34 = arith.constant 0.000000e+00 : f32
    %378 = vector.broadcast %cst_34 : f32 to vector<1x256xf32>
    %cst_35 = arith.constant 0.000000e+00 : f32
    %379 = vector.broadcast %cst_35 : f32 to vector<1x256xf32>
    %c28 = arith.constant 28 : index
    %380 = memref.load %arg1[%c28] : memref<99xf32, #tpu.memory_space<smem>>
    %c77 = arith.constant 77 : index
    %381 = memref.load %arg1[%c77] : memref<99xf32, #tpu.memory_space<smem>>
    %382 = vector.extract_strided_slice %14 {offsets = [0, 0], sizes = [1, 256], strides = [1, 1]} : vector<1x512xf32> to vector<1x256xf32>
    %383 = vector.broadcast %380 : f32 to vector<1x256xf32>
    %384 = arith.mulf %383, %382 : vector<1x256xf32>
    %385 = vector.extract_strided_slice %14 {offsets = [0, 256], sizes = [1, 256], strides = [1, 1]} : vector<1x512xf32> to vector<1x256xf32>
    %386 = vector.broadcast %381 : f32 to vector<1x256xf32>
    %387 = arith.mulf %386, %385 : vector<1x256xf32>
    %388 = arith.addf %384, %387 : vector<1x256xf32>
    %389 = arith.addf %378, %388 : vector<1x256xf32>
    %c29 = arith.constant 29 : index
    %390 = memref.load %arg1[%c29] : memref<99xf32, #tpu.memory_space<smem>>
    %c78 = arith.constant 78 : index
    %391 = memref.load %arg1[%c78] : memref<99xf32, #tpu.memory_space<smem>>
    %392 = vector.extract_strided_slice %22 {offsets = [0, 0], sizes = [1, 256], strides = [1, 1]} : vector<1x512xf32> to vector<1x256xf32>
    %393 = vector.broadcast %390 : f32 to vector<1x256xf32>
    %394 = arith.mulf %393, %392 : vector<1x256xf32>
    %395 = vector.extract_strided_slice %22 {offsets = [0, 256], sizes = [1, 256], strides = [1, 1]} : vector<1x512xf32> to vector<1x256xf32>
    %396 = vector.broadcast %391 : f32 to vector<1x256xf32>
    %397 = arith.mulf %396, %395 : vector<1x256xf32>
    %398 = arith.addf %394, %397 : vector<1x256xf32>
    %399 = arith.addf %379, %398 : vector<1x256xf32>
    %c30 = arith.constant 30 : index
    %400 = memref.load %arg1[%c30] : memref<99xf32, #tpu.memory_space<smem>>
    %c79 = arith.constant 79 : index
    %401 = memref.load %arg1[%c79] : memref<99xf32, #tpu.memory_space<smem>>
    %402 = vector.extract_strided_slice %30 {offsets = [0, 0], sizes = [1, 256], strides = [1, 1]} : vector<1x512xf32> to vector<1x256xf32>
    %403 = vector.broadcast %400 : f32 to vector<1x256xf32>
    %404 = arith.mulf %403, %402 : vector<1x256xf32>
    %405 = vector.extract_strided_slice %30 {offsets = [0, 256], sizes = [1, 256], strides = [1, 1]} : vector<1x512xf32> to vector<1x256xf32>
    %406 = vector.broadcast %401 : f32 to vector<1x256xf32>
    %407 = arith.mulf %406, %405 : vector<1x256xf32>
    %408 = arith.addf %404, %407 : vector<1x256xf32>
    %409 = arith.addf %389, %408 : vector<1x256xf32>
    %c31 = arith.constant 31 : index
    %410 = memref.load %arg1[%c31] : memref<99xf32, #tpu.memory_space<smem>>
    %c80 = arith.constant 80 : index
    %411 = memref.load %arg1[%c80] : memref<99xf32, #tpu.memory_space<smem>>
    %412 = vector.extract_strided_slice %5 {offsets = [0, 0], sizes = [1, 256], strides = [1, 1]} : vector<1x512xf32> to vector<1x256xf32>
    %413 = vector.broadcast %410 : f32 to vector<1x256xf32>
    %414 = arith.mulf %413, %412 : vector<1x256xf32>
    %415 = vector.extract_strided_slice %5 {offsets = [0, 256], sizes = [1, 256], strides = [1, 1]} : vector<1x512xf32> to vector<1x256xf32>
    %416 = vector.broadcast %411 : f32 to vector<1x256xf32>
    %417 = arith.mulf %416, %415 : vector<1x256xf32>
    %418 = arith.addf %414, %417 : vector<1x256xf32>
    %419 = arith.addf %399, %418 : vector<1x256xf32>
    %c32 = arith.constant 32 : index
    %420 = memref.load %arg1[%c32] : memref<99xf32, #tpu.memory_space<smem>>
    %c81 = arith.constant 81 : index
    %421 = memref.load %arg1[%c81] : memref<99xf32, #tpu.memory_space<smem>>
    %422 = vector.extract_strided_slice %38 {offsets = [0, 0], sizes = [1, 256], strides = [1, 1]} : vector<1x512xf32> to vector<1x256xf32>
    %423 = vector.broadcast %420 : f32 to vector<1x256xf32>
    %424 = arith.mulf %423, %422 : vector<1x256xf32>
    %425 = vector.extract_strided_slice %38 {offsets = [0, 256], sizes = [1, 256], strides = [1, 1]} : vector<1x512xf32> to vector<1x256xf32>
    %426 = vector.broadcast %421 : f32 to vector<1x256xf32>
    %427 = arith.mulf %426, %425 : vector<1x256xf32>
    %428 = arith.addf %424, %427 : vector<1x256xf32>
    %429 = arith.addf %409, %428 : vector<1x256xf32>
    %c33 = arith.constant 33 : index
    %430 = memref.load %arg1[%c33] : memref<99xf32, #tpu.memory_space<smem>>
    %c82 = arith.constant 82 : index
    %431 = memref.load %arg1[%c82] : memref<99xf32, #tpu.memory_space<smem>>
    %432 = vector.extract_strided_slice %46 {offsets = [0, 0], sizes = [1, 256], strides = [1, 1]} : vector<1x512xf32> to vector<1x256xf32>
    %433 = vector.broadcast %430 : f32 to vector<1x256xf32>
    %434 = arith.mulf %433, %432 : vector<1x256xf32>
    %435 = vector.extract_strided_slice %46 {offsets = [0, 256], sizes = [1, 256], strides = [1, 1]} : vector<1x512xf32> to vector<1x256xf32>
    %436 = vector.broadcast %431 : f32 to vector<1x256xf32>
    %437 = arith.mulf %436, %435 : vector<1x256xf32>
    %438 = arith.addf %434, %437 : vector<1x256xf32>
    %439 = arith.addf %419, %438 : vector<1x256xf32>
    %c34 = arith.constant 34 : index
    %440 = memref.load %arg1[%c34] : memref<99xf32, #tpu.memory_space<smem>>
    %c83 = arith.constant 83 : index
    %441 = memref.load %arg1[%c83] : memref<99xf32, #tpu.memory_space<smem>>
    %442 = vector.extract_strided_slice %54 {offsets = [0, 0], sizes = [1, 256], strides = [1, 1]} : vector<1x512xf32> to vector<1x256xf32>
    %443 = vector.broadcast %440 : f32 to vector<1x256xf32>
    %444 = arith.mulf %443, %442 : vector<1x256xf32>
    %445 = vector.extract_strided_slice %54 {offsets = [0, 256], sizes = [1, 256], strides = [1, 1]} : vector<1x512xf32> to vector<1x256xf32>
    %446 = vector.broadcast %441 : f32 to vector<1x256xf32>
    %447 = arith.mulf %446, %445 : vector<1x256xf32>
    %448 = arith.addf %444, %447 : vector<1x256xf32>
    %449 = arith.addf %429, %448 : vector<1x256xf32>
    %450 = arith.addf %449, %439 : vector<1x256xf32>
    %c240_i32 = arith.constant 240 : i32
    %451 = tpu.dynamic_rotate %450 by %c240_i32 dim 1 : vector<1x256xf32>, i32 -> vector<1x256xf32>
    %c0_i32 = arith.constant 0 : i32
    %452 = vector.broadcast %c0_i32 : i32 to vector<1x256xi32>
    %453 = arith.cmpi sge, %55, %452 : vector<1x256xi32>
    %c240_i32_36 = arith.constant 240 : i32
    %454 = vector.broadcast %c240_i32_36 : i32 to vector<1x256xi32>
    %455 = arith.cmpi slt, %55, %454 : vector<1x256xi32>
    %456 = arith.andi %453, %455 : vector<1x256xi1>
    %cst_37 = arith.constant 0.000000e+00 : f32
    %457 = vector.broadcast %cst_37 : f32 to vector<1x256xf32>
    %458 = arith.select %456, %451, %457 : vector<1x256xi1>, vector<1x256xf32>
    %459 = arith.addf %303, %458 : vector<1x256xf32>
    %cst_38 = arith.constant 0.000000e+00 : f32
    %460 = vector.broadcast %cst_38 : f32 to vector<1x256xf32>
    %cst_39 = arith.constant 0.000000e+00 : f32
    %461 = vector.broadcast %cst_39 : f32 to vector<1x256xf32>
    %c35 = arith.constant 35 : index
    %462 = memref.load %arg1[%c35] : memref<99xf32, #tpu.memory_space<smem>>
    %c84 = arith.constant 84 : index
    %463 = memref.load %arg1[%c84] : memref<99xf32, #tpu.memory_space<smem>>
    %464 = vector.extract_strided_slice %14 {offsets = [0, 0], sizes = [1, 256], strides = [1, 1]} : vector<1x512xf32> to vector<1x256xf32>
    %465 = vector.broadcast %462 : f32 to vector<1x256xf32>
    %466 = arith.mulf %465, %464 : vector<1x256xf32>
    %467 = vector.extract_strided_slice %14 {offsets = [0, 256], sizes = [1, 256], strides = [1, 1]} : vector<1x512xf32> to vector<1x256xf32>
    %468 = vector.broadcast %463 : f32 to vector<1x256xf32>
    %469 = arith.mulf %468, %467 : vector<1x256xf32>
    %470 = arith.addf %466, %469 : vector<1x256xf32>
    %471 = arith.addf %460, %470 : vector<1x256xf32>
    %c36 = arith.constant 36 : index
    %472 = memref.load %arg1[%c36] : memref<99xf32, #tpu.memory_space<smem>>
    %c85 = arith.constant 85 : index
    %473 = memref.load %arg1[%c85] : memref<99xf32, #tpu.memory_space<smem>>
    %474 = vector.extract_strided_slice %22 {offsets = [0, 0], sizes = [1, 256], strides = [1, 1]} : vector<1x512xf32> to vector<1x256xf32>
    %475 = vector.broadcast %472 : f32 to vector<1x256xf32>
    %476 = arith.mulf %475, %474 : vector<1x256xf32>
    %477 = vector.extract_strided_slice %22 {offsets = [0, 256], sizes = [1, 256], strides = [1, 1]} : vector<1x512xf32> to vector<1x256xf32>
    %478 = vector.broadcast %473 : f32 to vector<1x256xf32>
    %479 = arith.mulf %478, %477 : vector<1x256xf32>
    %480 = arith.addf %476, %479 : vector<1x256xf32>
    %481 = arith.addf %461, %480 : vector<1x256xf32>
    %c37 = arith.constant 37 : index
    %482 = memref.load %arg1[%c37] : memref<99xf32, #tpu.memory_space<smem>>
    %c86 = arith.constant 86 : index
    %483 = memref.load %arg1[%c86] : memref<99xf32, #tpu.memory_space<smem>>
    %484 = vector.extract_strided_slice %30 {offsets = [0, 0], sizes = [1, 256], strides = [1, 1]} : vector<1x512xf32> to vector<1x256xf32>
    %485 = vector.broadcast %482 : f32 to vector<1x256xf32>
    %486 = arith.mulf %485, %484 : vector<1x256xf32>
    %487 = vector.extract_strided_slice %30 {offsets = [0, 256], sizes = [1, 256], strides = [1, 1]} : vector<1x512xf32> to vector<1x256xf32>
    %488 = vector.broadcast %483 : f32 to vector<1x256xf32>
    %489 = arith.mulf %488, %487 : vector<1x256xf32>
    %490 = arith.addf %486, %489 : vector<1x256xf32>
    %491 = arith.addf %471, %490 : vector<1x256xf32>
    %c38 = arith.constant 38 : index
    %492 = memref.load %arg1[%c38] : memref<99xf32, #tpu.memory_space<smem>>
    %c87 = arith.constant 87 : index
    %493 = memref.load %arg1[%c87] : memref<99xf32, #tpu.memory_space<smem>>
    %494 = vector.extract_strided_slice %5 {offsets = [0, 0], sizes = [1, 256], strides = [1, 1]} : vector<1x512xf32> to vector<1x256xf32>
    %495 = vector.broadcast %492 : f32 to vector<1x256xf32>
    %496 = arith.mulf %495, %494 : vector<1x256xf32>
    %497 = vector.extract_strided_slice %5 {offsets = [0, 256], sizes = [1, 256], strides = [1, 1]} : vector<1x512xf32> to vector<1x256xf32>
    %498 = vector.broadcast %493 : f32 to vector<1x256xf32>
    %499 = arith.mulf %498, %497 : vector<1x256xf32>
    %500 = arith.addf %496, %499 : vector<1x256xf32>
    %501 = arith.addf %481, %500 : vector<1x256xf32>
    %c39 = arith.constant 39 : index
    %502 = memref.load %arg1[%c39] : memref<99xf32, #tpu.memory_space<smem>>
    %c88 = arith.constant 88 : index
    %503 = memref.load %arg1[%c88] : memref<99xf32, #tpu.memory_space<smem>>
    %504 = vector.extract_strided_slice %38 {offsets = [0, 0], sizes = [1, 256], strides = [1, 1]} : vector<1x512xf32> to vector<1x256xf32>
    %505 = vector.broadcast %502 : f32 to vector<1x256xf32>
    %506 = arith.mulf %505, %504 : vector<1x256xf32>
    %507 = vector.extract_strided_slice %38 {offsets = [0, 256], sizes = [1, 256], strides = [1, 1]} : vector<1x512xf32> to vector<1x256xf32>
    %508 = vector.broadcast %503 : f32 to vector<1x256xf32>
    %509 = arith.mulf %508, %507 : vector<1x256xf32>
    %510 = arith.addf %506, %509 : vector<1x256xf32>
    %511 = arith.addf %491, %510 : vector<1x256xf32>
    %c40 = arith.constant 40 : index
    %512 = memref.load %arg1[%c40] : memref<99xf32, #tpu.memory_space<smem>>
    %c89 = arith.constant 89 : index
    %513 = memref.load %arg1[%c89] : memref<99xf32, #tpu.memory_space<smem>>
    %514 = vector.extract_strided_slice %46 {offsets = [0, 0], sizes = [1, 256], strides = [1, 1]} : vector<1x512xf32> to vector<1x256xf32>
    %515 = vector.broadcast %512 : f32 to vector<1x256xf32>
    %516 = arith.mulf %515, %514 : vector<1x256xf32>
    %517 = vector.extract_strided_slice %46 {offsets = [0, 256], sizes = [1, 256], strides = [1, 1]} : vector<1x512xf32> to vector<1x256xf32>
    %518 = vector.broadcast %513 : f32 to vector<1x256xf32>
    %519 = arith.mulf %518, %517 : vector<1x256xf32>
    %520 = arith.addf %516, %519 : vector<1x256xf32>
    %521 = arith.addf %501, %520 : vector<1x256xf32>
    %c41 = arith.constant 41 : index
    %522 = memref.load %arg1[%c41] : memref<99xf32, #tpu.memory_space<smem>>
    %c90 = arith.constant 90 : index
    %523 = memref.load %arg1[%c90] : memref<99xf32, #tpu.memory_space<smem>>
    %524 = vector.extract_strided_slice %54 {offsets = [0, 0], sizes = [1, 256], strides = [1, 1]} : vector<1x512xf32> to vector<1x256xf32>
    %525 = vector.broadcast %522 : f32 to vector<1x256xf32>
    %526 = arith.mulf %525, %524 : vector<1x256xf32>
    %527 = vector.extract_strided_slice %54 {offsets = [0, 256], sizes = [1, 256], strides = [1, 1]} : vector<1x512xf32> to vector<1x256xf32>
    %528 = vector.broadcast %523 : f32 to vector<1x256xf32>
    %529 = arith.mulf %528, %527 : vector<1x256xf32>
    %530 = arith.addf %526, %529 : vector<1x256xf32>
    %531 = arith.addf %511, %530 : vector<1x256xf32>
    %532 = arith.addf %531, %521 : vector<1x256xf32>
    %c224_i32 = arith.constant 224 : i32
    %533 = tpu.dynamic_rotate %532 by %c224_i32 dim 1 : vector<1x256xf32>, i32 -> vector<1x256xf32>
    %c0_i32_40 = arith.constant 0 : i32
    %534 = vector.broadcast %c0_i32_40 : i32 to vector<1x256xi32>
    %535 = arith.cmpi sge, %55, %534 : vector<1x256xi32>
    %c224_i32_41 = arith.constant 224 : i32
    %536 = vector.broadcast %c224_i32_41 : i32 to vector<1x256xi32>
    %537 = arith.cmpi slt, %55, %536 : vector<1x256xi32>
    %538 = arith.andi %535, %537 : vector<1x256xi1>
    %cst_42 = arith.constant 0.000000e+00 : f32
    %539 = vector.broadcast %cst_42 : f32 to vector<1x256xf32>
    %540 = arith.select %538, %533, %539 : vector<1x256xi1>, vector<1x256xf32>
    %541 = arith.addf %377, %540 : vector<1x256xf32>
    %cst_43 = arith.constant 0.000000e+00 : f32
    %542 = vector.broadcast %cst_43 : f32 to vector<1x256xf32>
    %cst_44 = arith.constant 0.000000e+00 : f32
    %543 = vector.broadcast %cst_44 : f32 to vector<1x256xf32>
    %c42 = arith.constant 42 : index
    %544 = memref.load %arg1[%c42] : memref<99xf32, #tpu.memory_space<smem>>
    %c91 = arith.constant 91 : index
    %545 = memref.load %arg1[%c91] : memref<99xf32, #tpu.memory_space<smem>>
    %546 = vector.extract_strided_slice %14 {offsets = [0, 0], sizes = [1, 256], strides = [1, 1]} : vector<1x512xf32> to vector<1x256xf32>
    %547 = vector.broadcast %544 : f32 to vector<1x256xf32>
    %548 = arith.mulf %547, %546 : vector<1x256xf32>
    %549 = vector.extract_strided_slice %14 {offsets = [0, 256], sizes = [1, 256], strides = [1, 1]} : vector<1x512xf32> to vector<1x256xf32>
    %550 = vector.broadcast %545 : f32 to vector<1x256xf32>
    %551 = arith.mulf %550, %549 : vector<1x256xf32>
    %552 = arith.addf %548, %551 : vector<1x256xf32>
    %553 = arith.addf %542, %552 : vector<1x256xf32>
    %c43 = arith.constant 43 : index
    %554 = memref.load %arg1[%c43] : memref<99xf32, #tpu.memory_space<smem>>
    %c92 = arith.constant 92 : index
    %555 = memref.load %arg1[%c92] : memref<99xf32, #tpu.memory_space<smem>>
    %556 = vector.extract_strided_slice %22 {offsets = [0, 0], sizes = [1, 256], strides = [1, 1]} : vector<1x512xf32> to vector<1x256xf32>
    %557 = vector.broadcast %554 : f32 to vector<1x256xf32>
    %558 = arith.mulf %557, %556 : vector<1x256xf32>
    %559 = vector.extract_strided_slice %22 {offsets = [0, 256], sizes = [1, 256], strides = [1, 1]} : vector<1x512xf32> to vector<1x256xf32>
    %560 = vector.broadcast %555 : f32 to vector<1x256xf32>
    %561 = arith.mulf %560, %559 : vector<1x256xf32>
    %562 = arith.addf %558, %561 : vector<1x256xf32>
    %563 = arith.addf %543, %562 : vector<1x256xf32>
    %c44 = arith.constant 44 : index
    %564 = memref.load %arg1[%c44] : memref<99xf32, #tpu.memory_space<smem>>
    %c93 = arith.constant 93 : index
    %565 = memref.load %arg1[%c93] : memref<99xf32, #tpu.memory_space<smem>>
    %566 = vector.extract_strided_slice %30 {offsets = [0, 0], sizes = [1, 256], strides = [1, 1]} : vector<1x512xf32> to vector<1x256xf32>
    %567 = vector.broadcast %564 : f32 to vector<1x256xf32>
    %568 = arith.mulf %567, %566 : vector<1x256xf32>
    %569 = vector.extract_strided_slice %30 {offsets = [0, 256], sizes = [1, 256], strides = [1, 1]} : vector<1x512xf32> to vector<1x256xf32>
    %570 = vector.broadcast %565 : f32 to vector<1x256xf32>
    %571 = arith.mulf %570, %569 : vector<1x256xf32>
    %572 = arith.addf %568, %571 : vector<1x256xf32>
    %573 = arith.addf %553, %572 : vector<1x256xf32>
    %c45 = arith.constant 45 : index
    %574 = memref.load %arg1[%c45] : memref<99xf32, #tpu.memory_space<smem>>
    %c94 = arith.constant 94 : index
    %575 = memref.load %arg1[%c94] : memref<99xf32, #tpu.memory_space<smem>>
    %576 = vector.extract_strided_slice %5 {offsets = [0, 0], sizes = [1, 256], strides = [1, 1]} : vector<1x512xf32> to vector<1x256xf32>
    %577 = vector.broadcast %574 : f32 to vector<1x256xf32>
    %578 = arith.mulf %577, %576 : vector<1x256xf32>
    %579 = vector.extract_strided_slice %5 {offsets = [0, 256], sizes = [1, 256], strides = [1, 1]} : vector<1x512xf32> to vector<1x256xf32>
    %580 = vector.broadcast %575 : f32 to vector<1x256xf32>
    %581 = arith.mulf %580, %579 : vector<1x256xf32>
    %582 = arith.addf %578, %581 : vector<1x256xf32>
    %583 = arith.addf %563, %582 : vector<1x256xf32>
    %c46 = arith.constant 46 : index
    %584 = memref.load %arg1[%c46] : memref<99xf32, #tpu.memory_space<smem>>
    %c95 = arith.constant 95 : index
    %585 = memref.load %arg1[%c95] : memref<99xf32, #tpu.memory_space<smem>>
    %586 = vector.extract_strided_slice %38 {offsets = [0, 0], sizes = [1, 256], strides = [1, 1]} : vector<1x512xf32> to vector<1x256xf32>
    %587 = vector.broadcast %584 : f32 to vector<1x256xf32>
    %588 = arith.mulf %587, %586 : vector<1x256xf32>
    %589 = vector.extract_strided_slice %38 {offsets = [0, 256], sizes = [1, 256], strides = [1, 1]} : vector<1x512xf32> to vector<1x256xf32>
    %590 = vector.broadcast %585 : f32 to vector<1x256xf32>
    %591 = arith.mulf %590, %589 : vector<1x256xf32>
    %592 = arith.addf %588, %591 : vector<1x256xf32>
    %593 = arith.addf %573, %592 : vector<1x256xf32>
    %c47 = arith.constant 47 : index
    %594 = memref.load %arg1[%c47] : memref<99xf32, #tpu.memory_space<smem>>
    %c96 = arith.constant 96 : index
    %595 = memref.load %arg1[%c96] : memref<99xf32, #tpu.memory_space<smem>>
    %596 = vector.extract_strided_slice %46 {offsets = [0, 0], sizes = [1, 256], strides = [1, 1]} : vector<1x512xf32> to vector<1x256xf32>
    %597 = vector.broadcast %594 : f32 to vector<1x256xf32>
    %598 = arith.mulf %597, %596 : vector<1x256xf32>
    %599 = vector.extract_strided_slice %46 {offsets = [0, 256], sizes = [1, 256], strides = [1, 1]} : vector<1x512xf32> to vector<1x256xf32>
    %600 = vector.broadcast %595 : f32 to vector<1x256xf32>
    %601 = arith.mulf %600, %599 : vector<1x256xf32>
    %602 = arith.addf %598, %601 : vector<1x256xf32>
    %603 = arith.addf %583, %602 : vector<1x256xf32>
    %c48 = arith.constant 48 : index
    %604 = memref.load %arg1[%c48] : memref<99xf32, #tpu.memory_space<smem>>
    %c97 = arith.constant 97 : index
    %605 = memref.load %arg1[%c97] : memref<99xf32, #tpu.memory_space<smem>>
    %606 = vector.extract_strided_slice %54 {offsets = [0, 0], sizes = [1, 256], strides = [1, 1]} : vector<1x512xf32> to vector<1x256xf32>
    %607 = vector.broadcast %604 : f32 to vector<1x256xf32>
    %608 = arith.mulf %607, %606 : vector<1x256xf32>
    %609 = vector.extract_strided_slice %54 {offsets = [0, 256], sizes = [1, 256], strides = [1, 1]} : vector<1x512xf32> to vector<1x256xf32>
    %610 = vector.broadcast %605 : f32 to vector<1x256xf32>
    %611 = arith.mulf %610, %609 : vector<1x256xf32>
    %612 = arith.addf %608, %611 : vector<1x256xf32>
    %613 = arith.addf %593, %612 : vector<1x256xf32>
    %614 = arith.addf %613, %603 : vector<1x256xf32>
    %c208_i32 = arith.constant 208 : i32
    %615 = tpu.dynamic_rotate %614 by %c208_i32 dim 1 : vector<1x256xf32>, i32 -> vector<1x256xf32>
    %c0_i32_45 = arith.constant 0 : i32
    %616 = vector.broadcast %c0_i32_45 : i32 to vector<1x256xi32>
    %617 = arith.cmpi sge, %55, %616 : vector<1x256xi32>
    %c208_i32_46 = arith.constant 208 : i32
    %618 = vector.broadcast %c208_i32_46 : i32 to vector<1x256xi32>
    %619 = arith.cmpi slt, %55, %618 : vector<1x256xi32>
    %620 = arith.andi %617, %619 : vector<1x256xi1>
    %cst_47 = arith.constant 0.000000e+00 : f32
    %621 = vector.broadcast %cst_47 : f32 to vector<1x256xf32>
    %622 = arith.select %620, %615, %621 : vector<1x256xi1>, vector<1x256xf32>
    %623 = arith.addf %459, %622 : vector<1x256xf32>
    %624 = arith.addf %623, %541 : vector<1x256xf32>
    %c98 = arith.constant 98 : index
    %625 = memref.load %arg1[%c98] : memref<99xf32, #tpu.memory_space<smem>>
    %626 = vector.broadcast %625 : f32 to vector<1x256xf32>
    %627 = arith.addf %624, %626 : vector<1x256xf32>
    %628 = arith.negf %627 : vector<1x256xf32>
    %629 = math.exp %628 : vector<1x256xf32>
    %cst_48 = arith.constant 1.000000e+00 : f32
    %630 = vector.broadcast %cst_48 : f32 to vector<1x256xf32>
    %631 = arith.addf %630, %629 : vector<1x256xf32>
    %632 = arith.divf %630, %631 : vector<1x256xf32>
    %633 = vector.shape_cast %632 : vector<1x256xf32> to vector<1x1x256xf32>
    %634 = vector.broadcast %633 : vector<1x1x256xf32> to vector<1x4x256xf32>
    %635 = arith.mulf %0, %634 : vector<1x4x256xf32>
    %c0_49 = arith.constant 0 : index
    %c0_50 = arith.constant 0 : index
    %c0_51 = arith.constant 0 : index
    %636 = vector.load %arg4[%c0_49, %c0_50, %c0_51] : memref<1x4x256xf32, #tpu.memory_space<vmem>>, vector<1x4x256xf32>
    tpu.vector_store %arg4[%c0_49, %c0_50, %c0_51], %635 {strides = array<i32>} : memref<1x4x256xf32, #tpu.memory_space<vmem>>, vector<1x4x256xf32>,
    return
  }
  func.func @transform_0(%arg0: i32) -> i32 {
    %c0_i32 = arith.constant 0 : i32
    %c0_i32_0 = arith.constant 0 : i32
    return %c0_i32 : i32
  }
  func.func @transform_1(%arg0: i32) -> (i32, i32) {
    %c0_i32 = arith.constant 0 : i32
    %c0_i32_0 = arith.constant 0 : i32
    %c0_i32_1 = arith.constant 0 : i32
    return %c0_i32, %c0_i32_0 : i32, i32
  }
  func.func @transform_2(%arg0: i32) -> (i32, i32, i32) {
    %c0_i32 = arith.constant 0 : i32
    %c0_i32_0 = arith.constant 0 : i32
    %c0_i32_1 = arith.constant 0 : i32
    return %arg0, %c0_i32, %c0_i32_0 : i32, i32, i32
  }
  func.func @transform_3(%arg0: i32) -> (i32, i32, i32) {
    %c0_i32 = arith.constant 0 : i32
    %c0_i32_0 = arith.constant 0 : i32
    %c0_i32_1 = arith.constant 0 : i32
    return %arg0, %c0_i32, %c0_i32_0 : i32, i32, i32
  }
}

</mosaic_0001>

<bundles_post_ra>
// kernel: tpu_custom_call.1
= control target key start
LH: loop header
LB: loop body
LE: loop exit
PB: predicated region body
PF: predicated region fallthrough
CT: control target
= control target key end

     0   :  { %s2970_s0 = inlined_call_operand.hbm [shape: f32[99], index: 0, kind: input, shape index: {}]   ;;  %s2971_s1 = inlined_call_operand.hbm [shape: s32[1,512], index: 1, kind: input, shape index: {}]   ;;  %s2972_s2 = inlined_call_operand.hbm [shape: f32[2,4,256], index: 2, kind: input, shape index: {}]   ;;  %s2973_s3 = inlined_call_operand.hbm [shape: f32[2,4,256], index: 3, kind: output, shape index: {}]  }
   0x1   :  { %3056 = sst [smem:[#allocation83_spill]] %s2970_s0 }
   0x2   :  { %3057 = sst [smem:[#allocation84_spill]] %s2971_s1 }
   0x3   :  { %3058 = sst [smem:[#allocation85_spill]] %s2972_s2 }
   0x4   :  { %3059 = sst [smem:[#allocation86_spill]] %s2973_s3 }
   0x5   :  { %8 = vsyncpa [#allocation5], 0 }
   0x6   :  { %9 = vsyncpa [#allocation3], 0 }
   0x7   :  { %10 = vsyncpa [#allocation8], 0 }
   0x8   :  { %12 = vsyncpa [#allocation8 + $0x1], 0 }
   0x9   :  { %13 = vsyncpa [#allocation4], 0 }
   0xa   :  { %15 = vsyncpa [#allocation4 + $0x1], 0  ;;  %s1799_s12 = smov 0   ;;  %s1801_s13 = smov 0  }
   0xb   :  { %s1803_s14 = smov 0   ;;  %s1805_s15 = smov 0  }
   0xc LB: > { %3060 = sst [smem:[#allocation14_spill]] %s1748_s12  ;;  %s1820_s16 = sadd.s32 4294967295, %s1760_s15   ;;  %s1760_s15 = sphi %s1805_s15, %s3291_s15   ;;  %s1756_s14 = sphi %s1803_s14, %s3294_s14   ;;  %s1752_s13 = sphi %s1801_s13, %s3293_s13   ;;  %s1748_s12 = sphi %s1799_s12, %s3292_s12  }
   0xd   : > { %3061 = sst [smem:[#allocation15_spill]] %s1752_s13  ;;  %s1405_s17 = sadd.s32 4294967294, %s1760_s15  }
   0xe   : > { %3062 = sst [smem:[#allocation16_spill]] %s1756_s14  ;;  %p83_p0 = scmp.ne.s32.totalorder %s1752_s13, %s1748_s12 }
   0xf   : > { %3063 = sst [smem:[#allocation17_spill]] %s1760_s15  ;;  %p2974_p1 = scmp.eq.s32.totalorder %s1820_s16, 0 }
  0x10   : > { %3064 = sst [smem:[#allocation18_spill]] %s1820_s16  ;;  %p113_p3 = scmp.eq.s32.totalorder %s1405_s17, 1 }
  0x11   : > { %p1829_p4 = por %p2974_p1, %p83_p0  ;;  %p1406_p5 = scmp.ge.s32.totalorder %s1760_s15, 1 }
  0x12   : > { %p1834_p6 = por %p113_p3, %p83_p0  ;;  %p120_p7 = scmp.lt.s32.totalorder %s1760_s15, 3 }
  0x13   : > { %s3065_s18 = scalar_select %p1829_p4, 1, 0 }
  0x14   : > { %s3066_s19 = scalar_select %p1834_p6, 1, 0 }
  0x15   : > { %p1839_p8 = pnand %p1406_p5, %p120_p7  ;;  %s1762_s21 = smov [#allocation6]  }
  0x16   : > { %3067 = sst [smem:[#allocation19_spill]] %s3066_s19  ;;  %s142_s22 = sshll.u32 %s1762_s21, 4  ;;  %s1846_s22 = int_to_ptr.vmem [resolvable:$true] %s142_s22 }
  0x17   : > { %p1537_p10 = pneg %p1839_p8  ;;  %s1855_s24 = sadd.s32 1, %s1760_s15  }
  0x18   : > { %3070 = sst [smem:[#allocation20_spill]] %s1855_s24  ;;  %s67_s25 = ssub.s32 %s1760_s15, %s1855_s24 }
  0x19   : > { %p1850_p11 = pnand %p1537_p10, %p2974_p1  ;;  %s70_s26 = sadd.s32 1, %s1756_s14 }
  0x1a   : > { %p1860_p12 = scmp.eq.s32.totalorder %s67_s25, 0  ;;  %s3072_s0 = sld [smem:[#allocation83_spill]] }
  0x1b   : > { %p1617_p0 = pneg %p1850_p11 }
  0x20   : > { %s1615_s30 = scalar_lea.hbm %s3072_s0, 16 }
  0x21   : > { %p1616_p13 = scmp.ne.s32.totalorder %s3072_s0, %s1615_s30  ;;  %p1622_p7 = scmp.lt.u32.totalorder %s1615_s30, %s3072_s0 }
  0x23   : > { %p1618_p3 = pnand %p1617_p0, %p1616_p13 }
  0x25   : > { %p1619_p5 = pneg %p1618_p3 }
  0x27   : > { %p1624_p10 = pnand %p1622_p7, %p1619_p5 }
  0x29   : > { %1627 = shalt.err (!%p1624_p10)
}
  0x2a   : > { %s1763_s8 = smov [#allocation2]   ;;  %s3073_s1 = sld [smem:[#allocation84_spill]] }
  0x2b   : > { %1540 = dma.hbm_to_smem (!%p1850_p11), %s3072_s0, 16, %s1763_s8, [#allocation5]  }
  0x30   : > { %s1628_s21 = scalar_lea.hbm %s3073_s1, 64 }
  0x31   : > { %p1629_p13 = scmp.ne.s32.totalorder %s3073_s1, %s1628_s21  ;;  %p1635_p7 = scmp.lt.u32.totalorder %s1628_s21, %s3073_s1 }
  0x33   : > { %p1631_p3 = pnand %p1629_p13, %p1617_p0 }
  0x35   : > { %p1632_p5 = pneg %p1631_p3 }
  0x37   : > { %p1637_p10 = pnand %p1635_p7, %p1632_p5 }
  0x39   : > { %1640 = shalt.err (!%p1637_p10)
}
  0x3a   : > { %s1641_s4 = scalar_lea.vmem %s1846_s22, 64  ;;  %p1649_p6 = scmp.lt.s32.totalorder %s1846_s22, %s1846_s22 }
  0x3b   : > { %p1642_p9 = scmp.ne.s32.totalorder %s1846_s22, %s1641_s4  ;;  %p1650_p13 = scmp.lt.s32.totalorder %s1641_s4, %s1641_s4 }
  0x3d   : > { %p1644_p1 = pnand %p1642_p9, %p1617_p0  ;;  %p1651_p3 = por %p1650_p13, %p1649_p6 }
  0x3f   : > { %p1645_p2 = pneg %p1644_p1 }
  0x41   : > { %p1652_p4 = pnand %p1651_p3, %p1645_p2 }
  0x43   : > { %1655 = shalt.err (!%p1652_p4)
}
  0x44   : > { %1543 = dma.hbm_to_vmem [thread:$0]  (!%p1850_p11), %s3073_s1, 64, %s1846_s22, [#allocation3]  }
  0x45   : > { %s1913_s7 = scalar_select %p1860_p12, %s1756_s14, %s70_s26  }
  0x46   : > { %p77_p1 = scmp.ne.s32.totalorder %s1756_s14, %s1752_s13  ;;  %p78_p2 = scmp.eq.s32.totalorder %s1760_s15, 0 }
  0x47   : > { %3074 = sst [smem:[#allocation21_spill]] %s1913_s7  ;;  %p1554_p4 = scmp.lt.s32.totalorder %s1760_s15, 2 }
  0x48   : > { %s153_s23 = sand.u32 1, %s1756_s14   ;;  %p79_p6 = por %p78_p2, %p77_p1 }
  0x49   : > { %p3075_p9 = scmp.eq.s32.totalorder %s1820_s16, 1  ;;  %s1410_s9 = sshll.u32 %s153_s23, 3 }
  0x4a   : > { %s1523_s10 = sshll.u32 %s1760_s15, 7  ;;  %s3078_s2 = sld [smem:[#allocation85_spill]] }
  0x4b   : > { %p1922_p0 = por %p3075_p9, %p77_p1  ;;  %s157_s26 = scalar_lea.vmem [#allocation7], %s1410_s9 }
  0x4c   : > { %s165_s27 = sshll.u32 %s157_s26, 4  ;;  %p1934_p11 = pnand %p1554_p4, %p79_p6  ;;  %s1932_s27 = int_to_ptr.vmem [resolvable:$true] %s165_s27 }
  0x4d   : > { %s3076_s8 = scalar_select %p1922_p0, 1, 0 }
  0x4e   : > { %s154_s25 = scalar_lea.sflag [#allocation8], %s153_s23  ;;  %p1658_p5 = pneg %p1934_p11 }
  0x4f   : > { %3077 = sst [smem:[#allocation22_spill]] %s3076_s8 }
  0x50   : > { %s1930_s22 = scalar_lea.hbm %s3078_s2, %s1523_s10  ;;  %s1661_s4 = scalar_lea.hbm %s3078_s2, 256 }
  0x51   : > { %s1656_s28 = scalar_lea.hbm %s1930_s22, 128  ;;  %p1662_p13 = scmp.lt.u32.totalorder %s1930_s22, %s3078_s2 }
  0x52   : > { %p1657_p12 = scmp.ne.s32.totalorder %s1930_s22, %s1656_s28  ;;  %p1663_p3 = scmp.lt.u32.totalorder %s1661_s4, %s1656_s28 }
  0x53   : > { %p1665_p2 = scmp.lt.u32.totalorder %s1656_s28, %s1930_s22 }
  0x54   : > { %p1659_p7 = pnand %p1658_p5, %p1657_p12  ;;  %p1664_p1 = por %p1663_p3, %p1662_p13 }
  0x56   : > { %p1660_p10 = pneg %p1659_p7  ;;  %p1666_p4 = por %p1665_p2, %p1664_p1 }
  0x58   : > { %p1667_p6 = pnand %p1666_p4, %p1660_p10 }
  0x5a   : > { %1670 = shalt.err (!%p1667_p6)
}
  0x5b   : > { %s1671_s23 = scalar_lea.vmem %s1932_s27, 128  ;;  %s1764_s9 = smov [#allocation7]  }
  0x5c   : > { %p1672_p9 = scmp.ne.s32.totalorder %s1932_s27, %s1671_s23  ;;  %s1676_s10 = sshll.u32 %s1764_s9, 4  ;;  %s1677_s10 = int_to_ptr.vmem [resolvable:$false] %s1676_s10 }
  0x5d   : > { %s1678_s11 = scalar_lea.vmem %s1677_s10, 256  ;;  %p1679_p0 = scmp.lt.s32.totalorder %s1932_s27, %s1677_s10 }
  0x5e   : > { %p1674_p12 = pnand %p1672_p9, %p1658_p5  ;;  %p1680_p13 = scmp.lt.s32.totalorder %s1678_s11, %s1671_s23 }
  0x60   : > { %p1675_p7 = pneg %p1674_p12  ;;  %p1681_p3 = por %p1680_p13, %p1679_p0 }
  0x62   : > { %p1682_p1 = pnand %p1681_p3, %p1675_p7 }
  0x64   : > { %1685 = shalt.err (!%p1682_p1)
}
  0x65   : > { %1547 = dma.hbm_to_vmem [thread:$0]  (!%p1934_p11), %s1930_s22, 128, %s1932_s27, %s154_s25  }
  0x66   : > { %174 = sbr.rel (%p1839_p8) target bundleno = 519 (0x207), region = 32 }
  0x6d   : > { %p3080_p5 = scmp.eq.s32.totalorder %s1820_s16, 0 }
  0x6f   : > { %1731 = dma.done.wait (%p3080_p5), [#allocation5], 16   ;;  %p3081_p10 = pmov %p3080_p5 }
  0x70   : > { %p3082_p2 = pmov %p3080_p5 }
  0x71   : > { %1733 = vsyncadd (%p3081_p10), [#allocation5], 4294967280 }
  0x72   : > { %1735 = dma.done.wait (%p3082_p2), [#allocation3], 64   ;;  %p3083_p0 = pmov %p3082_p2 }
  0x73   : > { %s1974_s17 = sand.u32 1, %s1752_s13   ;;  %p3086_p8 = scmp.ne.s32.totalorder %s3065_s18, 0 }
  0x74   : > { %1737 = vsyncadd (%p3083_p0), [#allocation3], 4294967232  ;;  %3084 = sst [smem:[#allocation23_spill]] %s1974_s17  ;;  %s2977_s20 = sshll.u32 %s1974_s17, 3 }
  0x75   : > { %s185_s22 = scalar_lea.sflag [#allocation8], %s1974_s17  ;;  %s1980_s26 = scalar_lea.vmem [#allocation7], %s2977_s20 }
  0x76   : > { %3085 = sst [smem:[#allocation24_spill]] %s1980_s26 }
  0x77   : > { %1739 = dma.done.wait (%p3086_p8), %s185_s22, 128  }
  0x78   : > { %1741 = vsyncadd (%p3086_p8), %s185_s22, 4294967168 }
  0x79   : > { %193 = sfence }
  0x7a   : > { %v212_v0 = vld [vmem:[%s1980_s26] sm:$0xff]  ;;  %vm216_vm0 = vcmask 1043456   ;;  %s1765_s18 = smov 3   ;;  %s1766_s27 = smov 1  }
  0x7b   : > { %v217_v1 = vsel %vm216_vm0, %v212_v0, -inf  ;;  %v231_v2 = vsel %vm216_vm0, %v212_v0, 0.0  ;;  %v214_v3 = vcombine.high %v212_v0, %v212_v0  ;;  %s1767_s21 = smov 2   ;;  %s1423_s25 = sld [smem:[#allocation2 + $0x3]] }
  0x7c   : > { %v218_v4 = vrot.slane %v217_v1, 4  ;;  %v232_v5 = vrot.slane %v231_v2, 4  ;;  %s1424_s28 = sld [smem:[#allocation2 + $0x34]]  ;;  %s1451_s29 = sld [smem:[#allocation2 + $0x11]] }
  0x7d   : > { %v224_v6 = vsel %vm216_vm0, %v214_v3, -inf  ;;  %v238_v7 = vsel %vm216_vm0, %v214_v3, 0.0  ;;  %s1452_s30 = sld [smem:[#allocation2 + $0x42]]  ;;  %s1438_s5 = sld [smem:[#allocation2 + $0x3b]] }
  0x7e   : > { %v219_v8 = vmax.f32 %v217_v1, %v218_v4  ;;  %v233_v9 = vadd.f32 %v232_v5, %v231_v2  ;;  %v225_v10 = vrot.slane %v224_v6, 4  ;;  %v239_v11 = vrot.slane %v238_v7, 4  ;;  %s1437_s4 = sld [smem:[#allocation2 + $0xa]]  ;;  %s1479_s6 = sld [smem:[#allocation2 + $0x1f]] }
  0x7f   : > { %s1768_s23 = smov 127   ;;  %s1480_s9 = sld [smem:[#allocation2 + $0x50]] }
  0x80   : > { %v220_v12 = vrot.slane %v219_v8, 2  ;;  %v234_v13 = vrot.slane %v233_v9, 2  ;;  %v226_v14 = vmax.f32 %v224_v6, %v225_v10  ;;  %v240_v15 = vadd.f32 %v239_v11, %v238_v7  ;;  %s1769_s10 = smov 126   ;;  %s1770_s11 = smov 125  }
  0x81   : > { %v562_v32 = vstv %s1423_s25  ;;  %s1493_s22 = sld [smem:[#allocation2 + $0x26]]  ;;  %s1465_s25 = sld [smem:[#allocation2 + $0x18]] }
  0x82   : > { %v221_v16 = vmax.f32 %v219_v8, %v220_v12  ;;  %v235_v17 = vadd.f32 %v234_v13, %v233_v9  ;;  %v227_v18 = vrot.slane %v226_v14, 2  ;;  %v241_v19 = vrot.slane %v240_v15, 2  ;;  %s2119_s20 = sld [smem:[#allocation2 + $0x40]]  ;;  %s2123_s1 = sld [smem:[#allocation2 + $0x1c]] }
  0x83   : > { %v565_v35 = vstv %s1424_s28  ;;  %v781_v38 = vstv %s1451_s29  ;;  %v784_v40 = vstv %s1452_s30  ;;  %v680_v52 = vstv %s1438_s5  ;;  %s1466_s28 = sld [smem:[#allocation2 + $0x49]]  ;;  %s2089_s29 = sld [smem:[#allocation2]] }
  0x84   : > { %v222_v20 = vrot.slane %v221_v16, 1  ;;  %v236_v21 = vrot.slane %v235_v17, 1  ;;  %v228_v22 = vmax.f32 %v226_v14, %v227_v18  ;;  %v242_v26 = vadd.f32 %v241_v19, %v240_v15  ;;  %s2091_s30 = sld [smem:[#allocation2 + $0xe]]  ;;  %s2095_s5 = sld [smem:[#allocation2 + $0x7]] }
  0x85   : > { %v677_v48 = vstv %s1437_s4  ;;  %v976_v58 = vstv %s1479_s6  ;;  %v979_v62 = vstv %s1480_s9  ;;  %s2093_s4 = sld [smem:[#allocation2 + $0x31]]  ;;  %s2097_s6 = sld [smem:[#allocation2 + $0x3f]] }
  0x86   : > { %v1987_v23 = vmax.f32 %v221_v16, %v222_v20  ;;  %v237_v24 = vadd.f32 %v236_v21, %v235_v17  ;;  %v229_v25 = vrot.slane %v228_v22, 1  ;;  %v243_v29 = vrot.slane %v242_v26, 1  ;;  %s2101_s9 = sld [smem:[#allocation2 + $0x2]]  ;;  %s2121_s0 = sld [smem:[#allocation2 + $0x8]] }
  0x87   : > { %v1082_v4 = vstv %s1493_s22  ;;  %s2107_s22 = sld [smem:[#allocation2 + $0x41]]  ;;  %s2127_s7 = sld [smem:[#allocation2 + $0x4d]] }
  0x88   : > { %248 = vrot.lane.b32.xlu0 %v1987_v23, %s1765_s18  ;;  %v1990_v27 = vmul.f32 0.25, %v237_v24  ;;  %v1993_v28 = vmax.f32 %v228_v22, %v229_v25  ;;  %v244_v30 = vadd.f32 %v243_v29, %v242_v26  ;;  %v563_v33 = vmul.f32 %v562_v32, %v1987_v23  ;;  %3102 = sst [smem:[#allocation40_spill]] %s2119_s20  ;;  %s2125_s2 = sld [smem:[#allocation2 + $0x39]] }
  0x89   : > { %v782_v39 = vmul.f32 %v781_v38, %v1987_v23  ;;  %v678_v50 = vmul.f32 %v677_v48, %v1987_v23  ;;  %v977_v60 = vmul.f32 %v976_v58, %v1987_v23  ;;  %v1083_v6 = vmul.f32 %v1082_v4, %v1987_v23  ;;  %3087 = sst [smem:[#allocation25_spill]] %s2089_s29  ;;  %s2129_s14 = sld [smem:[#allocation2 + $0x1e]] }
  0x8a   : > { %252 = vrot.lane.b32.xlu1 %v1990_v27, %s1765_s18  ;;  %v1999_v31 = vmul.f32 0.25, %v244_v30  ;;  %v564_v34 = vmul.f32 %v562_v32, %v1993_v28  ;;  %v566_v36 = vmul.f32 %v565_v35, %v1990_v27  ;;  %v783_v43 = vmul.f32 %v781_v38, %v1993_v28  ;;  %3088 = sst [smem:[#allocation26_spill]] %s2091_s30  ;;  %s2131_s13 = sld [smem:[#allocation2 + $0x4f]] }
  0x8b   : > { %v785_v44 = vmul.f32 %v784_v40, %v1990_v27  ;;  %v679_v51 = vmul.f32 %v677_v48, %v1993_v28  ;;  %v681_v54 = vmul.f32 %v680_v52, %v1990_v27  ;;  %v978_v61 = vmul.f32 %v976_v58, %v1993_v28  ;;  %3089 = sst [smem:[#allocation27_spill]] %s2093_s4  ;;  %s2133_s24 = sld [smem:[#allocation2 + $0x4]] }
  0x8c   : > { %342 = vrot.lane.b32.xlu0 %v1987_v23, %s1766_s27  ;;  %v567_v37 = vmul.f32 %v565_v35, %v1999_v31  ;;  %v2010_v41 = vadd.f32 %v566_v36, %v563_v33  ;;  %v786_v46 = vmul.f32 %v784_v40, %v1999_v31  ;;  %v682_v55 = vmul.f32 %v680_v52, %v1999_v31  ;;  %3090 = sst [smem:[#allocation28_spill]] %s2095_s5  ;;  %s2135_s15 = sld [smem:[#allocation2 + $0x23]] }
  0x8d   : > { %v2021_v47 = vadd.f32 %v785_v44, %v782_v39  ;;  %v2034_v56 = vadd.f32 %v681_v54, %v678_v50  ;;  %v980_v63 = vmul.f32 %v979_v62, %v1990_v27  ;;  %v981_v0 = vmul.f32 %v979_v62, %v1999_v31  ;;  %3091 = sst [smem:[#allocation29_spill]] %s2097_s6  ;;  %s2137_s19 = sld [smem:[#allocation2 + $0x12]] }
  0x8e   : > { %344 = vrot.lane.b32.xlu1 %v1993_v28, %s1766_s27  ;;  %v2012_v42 = vadd.f32 %v567_v37, %v564_v34  ;;  %v2023_v49 = vadd.f32 %v786_v46, %v783_v43  ;;  %v2036_v57 = vadd.f32 %v682_v55, %v679_v51  ;;  %v1084_v7 = vmul.f32 %v1082_v4, %v1993_v28  ;;  %3093 = sst [smem:[#allocation31_spill]] %s2101_s9  ;;  %s2139_s12 = sld [smem:[#allocation2 + $0x1d]] }
  0x8f   : > { %v2046_v1 = vadd.f32 %v980_v63, %v977_v60  ;;  %v2048_v2 = vadd.f32 %v981_v0, %v978_v61  ;;  %v885_v22 = vstv %s1465_s25  ;;  %v888_v26 = vstv %s1466_s28  ;;  %3096 = sst [smem:[#allocation34_spill]] %s2107_s22  ;;  %s2115_s25 = sld [smem:[#allocation2 + $0x3a]] }
  0x90   : > { %296 = vrot.lane.b32.xlu0 %v1987_v23, %s1767_s21  ;;  %v572_v45 = vcombine.low %v2010_v41, %v2012_v42  ;;  %v791_v53 = vcombine.low %v2021_v47, %v2023_v49  ;;  %v687_v59 = vcombine.low %v2034_v56, %v2036_v57  ;;  %v886_v24 = vmul.f32 %v885_v22, %v1987_v23  ;;  %s2117_s28 = sld [smem:[#allocation2 + $0x32]]  ;;  %3103 = sst [smem:[#allocation41_spill]] %s2121_s0 }
  0x91   : > { %v986_v3 = vcombine.low %v2046_v1, %v2048_v2  ;;  %v887_v25 = vmul.f32 %v885_v22, %v1993_v28  ;;  %v889_v29 = vmul.f32 %v888_v26, %v1990_v27  ;;  %v890_v30 = vmul.f32 %v888_v26, %v1999_v31  ;;  %3104 = sst [smem:[#allocation42_spill]] %s2123_s1  ;;  %s2141_s3 = sld [smem:[#allocation2 + $0x35]] }
  0x92   : > { %298 = vrot.lane.b32.xlu1 %v1993_v28, %s1767_s21  ;;  %3105 = sst [smem:[#allocation43_spill]] %s2125_s2  ;;  %s2143_s8 = sld [smem:[#allocation2 + $0x54]]  ;;  %v529_v38 = vstv %s2089_s29  ;;  %v757_v39 = vstv %s2091_s30  ;;  %v653_v40 = vstv %s2095_s5 }
  0x93   : > { %v2083_v32 = vadd.f32 %v889_v29, %v886_v24  ;;  %v2085_v33 = vadd.f32 %v890_v30, %v887_v25  ;;  %3106 = sst [smem:[#allocation44_spill]] %s2127_s7  ;;  %s2145_s26 = sld [smem:[#allocation2 + $0x43]]  ;;  %v531_v43 = vstv %s2093_s4  ;;  %v759_v46 = vstv %s2097_s6  ;;  %v2295_v30 = vld [vmem:[#allocation6] sm:$0xf] }
  0x94   : > { %250 = vrot.lane.b32.xlu0 %v1993_v28, %s1765_s18  ;;  %3107 = sst [smem:[#allocation45_spill]] %s2129_s14  ;;  %s2147_s17 = sld [smem:[#allocation2 + $0x4e]]  ;;  %v551_v50 = vstv %s2101_s9  ;;  %v775_v54 = vstv %s2107_s22  ;;  %v767_v60 = vstv %s2119_s20  ;;  %vm263_vm3 = vcmp.ge.s32.totalorder %v2295_v30, 3 }
  0x95   : > { %v895_v34 = vcombine.low %v2083_v32, %v2085_v33  ;;  %3100 = sst [smem:[#allocation38_spill]] %s2115_s25  ;;  %s2151_s16 = sld [smem:[#allocation2 + $0xb]]  ;;  %v661_v61 = vstv %s2121_s0  ;;  %v671_v63 = vstv %s2115_s25  ;;  %v663_v49 = vstv %s2125_s2 }
  0x96   : > { %254 = vrot.lane.b32.xlu1 %v1999_v31, %s1765_s18  ;;  %s1494_s18 = sld [smem:[#allocation2 + $0x57]]  ;;  %3101 = sst [smem:[#allocation39_spill]] %s2117_s28  ;;  %v542_v42 = vstv %s2117_s28  ;;  %v954_v0 = vstv %s2127_s7  ;;  %vm264_vm4 = vcmp.lt.s32.totalorder %v2295_v30, 19  ;;  %vm355_vm6 = vcmp.ge.s32.totalorder %v2295_v30, 1 }
  0x97   : > { %3108 = sst [smem:[#allocation46_spill]] %s2131_s13  ;;  %s2155_s13 = sld [smem:[#allocation2 + $0x5]]  ;;  %vm356_vm7 = vcmp.lt.s32.totalorder %v2295_v30, 17  ;;  %vm309_vm8 = vcmp.ge.s32.totalorder %v2295_v30, 2  ;;  %vm310_vm9 = vcmp.lt.s32.totalorder %v2295_v30, 18  ;;  %vm265_vm11 = vmand %vm263_vm3, %vm264_vm4  ;;  %vm401_vm13 = vcmp.ge.s32.totalorder %v2295_v30, 4294967295 }
  0x98   : > { %346 = vrot.lane.b32.xlu0 %v1990_v27, %s1766_s27  ;;  %3109 = sst [smem:[#allocation47_spill]] %s2133_s24  ;;  %s2194_s30 = sld [smem:[#allocation2 + $0x56]]  ;;  %vm2468_vm12 = vmand %vm355_vm6, %vm356_vm7  ;;  %vm402_vm14 = vcmp.lt.s32.totalorder %v2295_v30, 15  ;;  %vm448_vm3 = vcmp.lt.s32.totalorder %v2295_v30, 14  ;;  %vm494_vm6 = vcmp.lt.s32.totalorder %v2295_v30, 13 }
  0x99   : > { %3110 = sst [smem:[#allocation48_spill]] %s2135_s15  ;;  %s2153_s15 = sld [smem:[#allocation2 + $0x3c]]  ;;  %vm311_vm0 = vmand %vm309_vm8, %vm310_vm9 }
  0x9a   : > { %348 = vrot.lane.b32.xlu1 %v1999_v31, %s1766_s27  ;;  %s1507_s27 = sld [smem:[#allocation2 + $0x2d]]  ;;  %3111 = sst [smem:[#allocation49_spill]] %s2137_s19  ;;  %vm403_vm4 = vmand %vm401_vm13, %vm402_vm14 }
  0x9b   : > { %3112 = sst [smem:[#allocation50_spill]] %s2139_s12  ;;  %s2157_s19 = sld [smem:[#allocation2 + $0x13]] }
  0x9c   : > { %300 = vrot.lane.b32.xlu0 %v1990_v27, %s1767_s21  ;;  %v1085_v5 = vstv %s1494_s18  ;;  %s2109_s18 = sld [smem:[#allocation2 + $0x1]]  ;;  %3113 = sst [smem:[#allocation51_spill]] %s2141_s3 }
  0x9d   : > { %v1086_v8 = vmul.f32 %v1085_v5, %v1990_v27  ;;  %v1087_v9 = vmul.f32 %v1085_v5, %v1999_v31  ;;  %3114 = sst [smem:[#allocation52_spill]] %s2143_s8  ;;  %s2165_s3 = sld [smem:[#allocation2 + $0x2a]]  ;;  %v591_v5 = vstv %s2133_s24 }
  0x9e   : > { %302 = vrot.lane.b32.xlu1 %v1999_v31, %s1767_s21  ;;  %s1508_s21 = sld [smem:[#allocation2 + $0x5e]]  ;;  %3115 = sst [smem:[#allocation53_spill]] %s2145_s26 }
  0x9f   : > { %v2063_v10 = vadd.f32 %v1086_v8, %v1083_v6  ;;  %v2065_v11 = vadd.f32 %v1087_v9, %v1084_v7  ;;  %3116 = sst [smem:[#allocation54_spill]] %s2147_s17  ;;  %s2159_s8 = sld [smem:[#allocation2 + $0x36]] }
  0xa0   : > { %388 = vrot.lane.b32.xlu0 %v1987_v23, %s1768_s23  ;;  %v1186_v13 = vstv %s1507_s27  ;;  %s2111_s27 = sld [smem:[#allocation2 + $0x9]]  ;;  %3118 = sst [smem:[#allocation56_spill]] %s2153_s15 }
  0xa1   : > { %v1092_v12 = vcombine.low %v2063_v10, %v2065_v11  ;;  %v1187_v14 = vmul.f32 %v1186_v13, %v1987_v23  ;;  %v1188_v15 = vmul.f32 %v1186_v13, %v1993_v28  ;;  %3117 = sst [smem:[#allocation55_spill]] %s2151_s16  ;;  %s2161_s26 = sld [smem:[#allocation2 + $0x44]] }
  0xa2   : > { %390 = vrot.lane.b32.xlu1 %v1993_v28, %s1768_s23  ;;  %3097 = sst [smem:[#allocation35_spill]] %s2109_s18  ;;  %s2163_s17 = sld [smem:[#allocation2 + $0xc]]  ;;  %v540_v41 = vstv %s2109_s18 }
  0xa3   : > { %3119 = sst [smem:[#allocation57_spill]] %s2155_s13  ;;  %s2170_s15 = sld [smem:[#allocation2 + $0x25]] }
  0xa4   : > { %392 = vrot.lane.b32.xlu0 %v1990_v27, %s1768_s23  ;;  %v1189_v16 = vstv %s1508_s21  ;;  %s2113_s21 = sld [smem:[#allocation2 + $0xf]]  ;;  %3120 = sst [smem:[#allocation58_spill]] %s2157_s19 }
  0xa5   : > { %v1190_v17 = vmul.f32 %v1189_v16, %v1990_v27  ;;  %v1191_v18 = vmul.f32 %v1189_v16, %v1999_v31  ;;  %3123 = sst [smem:[#allocation61_spill]] %s2165_s3  ;;  %s2172_s13 = sld [smem:[#allocation2 + $0x5b]] }
  0xa6   : > { %394 = vrot.lane.b32.xlu1 %v1999_v31, %s1768_s23  ;;  %s2099_s23 = sld [smem:[#allocation2 + $0x38]]  ;;  %3098 = sst [smem:[#allocation36_spill]] %s2111_s27  ;;  %v669_v62 = vstv %s2111_s27 }
  0xa7   : > { %v2073_v19 = vadd.f32 %v1190_v17, %v1187_v14  ;;  %v2075_v20 = vadd.f32 %v1191_v18, %v1188_v15  ;;  %3121 = sst [smem:[#allocation59_spill]] %s2161_s26  ;;  %s2181_s3 = sld [smem:[#allocation2 + $0x20]] }
  0xa8   : > { %434 = vrot.lane.b32.xlu0 %v1987_v23, %s1769_s10  ;;  %3122 = sst [smem:[#allocation60_spill]] %s2163_s17  ;;  %s2179_s17 = sld [smem:[#allocation2 + $0x3d]] }
  0xa9   : > { %v1196_v21 = vcombine.low %v2073_v19, %v2075_v20  ;;  %3124 = sst [smem:[#allocation62_spill]] %s2170_s15  ;;  %s2200_s4 = sld [smem:[#allocation2 + $0x14]] }
  0xaa   : > { %436 = vrot.lane.b32.xlu1 %v1993_v28, %s1769_s10  ;;  %3099 = sst [smem:[#allocation37_spill]] %s2113_s21  ;;  %s2202_s5 = sld [smem:[#allocation2 + $0x51]] }
  0xab   : > { %3125 = sst [smem:[#allocation63_spill]] %s2172_s13  ;;  %s2190_s13 = sld [smem:[#allocation2 + $0x6]] }
  0xac   : > { %438 = vrot.lane.b32.xlu0 %v1990_v27, %s1769_s10  ;;  %3092 = sst [smem:[#allocation30_spill]] %s2099_s23  ;;  %v655_v48 = vstv %s2099_s23  ;;  %s2206_s6 = sld [smem:[#allocation2 + $0x37]] }
  0xad   : > { %3128 = sst [smem:[#allocation66_spill]] %s2194_s30  ;;  %s2220_s28 = sld [smem:[#allocation2 + $0x45]] }
  0xae   : > { %440 = vrot.lane.b32.xlu1 %v1999_v31, %s1769_s10  ;;  %s2103_s10 = sld [smem:[#allocation2 + $0x10]]  ;;  %3126 = sst [smem:[#allocation64_spill]] %s2179_s17 }
  0xaf   : > { %3129 = sst [smem:[#allocation67_spill]] %s2200_s4  ;;  %s3133_s9 = sld [smem:[#allocation49_spill]] }
  0xb0   : > { %480 = vrot.lane.b32.xlu0 %v1987_v23, %s1770_s11  ;;  %v1771_v23 = vmov 1966171168   ;;  %s3132_s18 = sld [smem:[#allocation51_spill]]  ;;  %s2232_s23 = sld [smem:[#allocation2 + $0x3e]] }
  0xb1   : > { %3127 = sst [smem:[#allocation65_spill]] %s2190_s13  ;;  %s2230_s22 = sld [smem:[#allocation2 + $0xd]] }
  0xb2   : > { %482 = vrot.lane.b32.xlu1 %v1993_v28, %s1770_s11  ;;  %v256_v28 = vlaneseq  ;;  %3130 = sst [smem:[#allocation68_spill]] %s2206_s6  ;;  %s3136_s20 = sld [smem:[#allocation53_spill]] }
  0xb3   : > { %3131 = sst [smem:[#allocation69_spill]] %s2220_s28  ;;  %s3137_s0 = sld [smem:[#allocation54_spill]] }
  0xb4   : > { %484 = vrot.lane.b32.xlu0 %v1990_v27, %s1770_s11  ;;  %3094 = sst [smem:[#allocation32_spill]] %s2103_s10  ;;  %v273_v27 = vunpack.c.l.s4 %v1771_v23  ;;  %v2149_v35 = vshrl.u32 %v256_v28, 7  ;;  %v2174_v37 = vand.u32 127, %v256_v28  ;;  %v773_v52 = vstv %s2103_s10  ;;  %s2215_s10 = sld [smem:[#allocation2 + $0x24]] }
  0xb5   : > { %s3138_s27 = sld [smem:[#allocation46_spill]]  ;;  %s2247_s2 = sld [smem:[#allocation2 + $0x21]]  ;;  %v810_v14 = vstv %s3133_s9 }
  0xb6   : > { %486 = vrot.lane.b32.xlu1 %v1999_v31, %s1770_s11  ;;  %s2105_s11 = sld [smem:[#allocation2 + $0x33]]  ;;  %v274_v31 = vunpack.c.0.s8 %v273_v27  ;;  %3135 = sst [smem:[#allocation71_spill]] %s2232_s23  ;;  %v593_v9 = vstv %s3132_s18  ;;  %vm258_vm1 = vcmp.lt.s32.totalorder %v2174_v37, 3  ;;  %vm350_vm2 = vcmp.lt.s32.totalorder %v2174_v37, 1 }
  0xb7   : > { %3134 = sst [smem:[#allocation70_spill]] %s2230_s22  ;;  %s3141_s7 = sld [smem:[#allocation56_spill]]  ;;  %v2344_v23 = vsub.s32 1, %v2149_v35  ;;  %vm304_vm5 = vcmp.lt.s32.totalorder %v2174_v37, 2  ;;  %vm396_vm10 = vcmp.lt.s32.totalorder %v2174_v37, 127  ;;  %vm442_vm15 = vcmp.lt.s32.totalorder %v2174_v37, 126 }
  0xb8   : > { %v2168_v36 = vsub.s32 %v274_v31, %v2149_v35  ;;  %s3142_s24 = sld [smem:[#allocation48_spill]]  ;;  %s2261_s14 = sld [smem:[#allocation2 + $0x27]]  ;;  %vm848_vm9 = vcmp.lt.s32.totalorder %v2174_v37, 16  ;;  %vm1043_vm13 = vcmp.lt.s32.totalorder %v2174_v37, 112  ;;  %vm641_vm14 = vcmp.ge.s32.totalorder %v2174_v37, 48 }
  0xb9   : > { %s2263_s12 = sld [smem:[#allocation2 + $0x15]]  ;;  %v962_v16 = vstv %s3137_s0  ;;  %s2272_s9 = sld [smem:[#allocation2 + $0x58]] }
  0xba   : > { %v2188_v44 = vrot.slane %v572_v45, %v2168_v36  ;;  %v765_v45 = vstv %s2113_s21  ;;  %v2213_v55 = vrot.slane %v791_v53, %v2168_v36  ;;  %s2225_s21 = sld [smem:[#allocation2 + $0x55]]  ;;  %v952_v53 = vstv %s2123_s1  ;;  %s2274_s29 = sld [smem:[#allocation2 + $0x2c]] }
  0xbb   : > { %v2243_v6 = vrot.slane %v687_v59, %v2168_v36  ;;  %v2259_v56 = vrot.slane %v986_v3, %v2168_v36  ;;  %v812_v59 = vstv %s3136_s20  ;;  %v970_v17 = vstv %s3138_s27  ;;  %s2291_s25 = sld [smem:[#allocation2 + $0x53]]  ;;  %s2302_s1 = sld [smem:[#allocation2 + $0x46]] }
  0xbc   : > { %3095 = sst [smem:[#allocation33_spill]] %s2105_s11  ;;  %v553_v51 = vstv %s2105_s11  ;;  %v586_v47 = vrot.slane %v2188_v44, %v2168_v36  ;;  %s2249_s11 = sld [smem:[#allocation2 + $0x52]]  ;;  %v805_v13 = vrot.slane %v2213_v55, %v2168_v36  ;;  %v2322_v25 = vrot.slane %v1092_v12, %v2168_v36 }
  0xbd   : > { %v708_v2 = vstv %s3141_s7  ;;  %s2293_s16 = sld [smem:[#allocation2 + $0x2b]]  ;;  %s2311_s18 = sld [smem:[#allocation2 + $0x28]]  ;;  %v2341_v12 = vsub.s32 0, %v2149_v35  ;;  %v2365_v28 = vrot.slane %v1196_v21, %v2168_v36 }
  0xbe   : > { %3144 = sst [smem:[#allocation54_spill]] %s2261_s14  ;;  %s2278_s14 = sld [smem:[#allocation2 + $0x22]]  ;;  %v1058_v3 = vstv %s3142_s24 }
  0xbf   : > { %3145 = sst [smem:[#allocation46_spill]] %s2263_s12  ;;  %s2313_s19 = sld [smem:[#allocation2 + $0x5c]] }
  0xc0   : > { %3147 = sst [smem:[#allocation56_spill]] %s2274_s29  ;;  %s2324_s12 = sld [smem:[#allocation2 + $0x59]] }
  0xc1   : > { %3151 = sst [smem:[#allocation73_spill]] %s2302_s1  ;;  %s2326_s4 = sld [smem:[#allocation2 + $0x17]] }
  0xc2   : > { %3140 = sst [smem:[#allocation53_spill]] %s2249_s11  ;;  %s2282_s11 = sld [smem:[#allocation2 + $0x5d]] }
  0xc3   : > { %3150 = sst [smem:[#allocation72_spill]] %s2293_s16  ;;  %s3154_s13 = sld [smem:[#allocation53_spill]]  ;;  %v1119_v19 = vstv %s2311_s18 }
  0xc4   : > { %s2336_s17 = sld [smem:[#allocation2 + $0x2e]]  ;;  %s2338_s26 = sld [smem:[#allocation2 + $0x48]] }
  0xc5   : > { %3152 = sst [smem:[#allocation74_spill]] %s2313_s19  ;;  %s2351_s28 = sld [smem:[#allocation2 + $0x29]] }
  0xc6   : > { %s2355_s22 = sld [smem:[#allocation2 + $0x16]]  ;;  %s2367_s15 = sld [smem:[#allocation2 + $0x5f]]  ;;  %v1121_v15 = vstv %s2324_s12 }
  0xc7   : > { %3153 = sst [smem:[#allocation75_spill]] %s2326_s4  ;;  %s2369_s23 = sld [smem:[#allocation2 + $0x47]] }
  0xc8   : > { %3149 = sst [smem:[#allocation48_spill]] %s2282_s11  ;;  %s2396_s11 = sld [smem:[#allocation2 + $0x2f]] }
  0xc9   : > { %s2375_s30 = sld [smem:[#allocation2 + $0x5a]]  ;;  %s2400_s29 = sld [smem:[#allocation2 + $0x19]] }
  0xca   : > { %3158 = sst [smem:[#allocation53_spill]] %s2336_s17  ;;  %s2408_s19 = sld [smem:[#allocation2 + $0x60]] }
  0xcb   : > { %3159 = sst [smem:[#allocation76_spill]] %s2338_s26  ;;  %s2410_s4 = sld [smem:[#allocation2 + $0x30]] }
  0xcc   : > { %3160 = sst [smem:[#allocation77_spill]] %s2355_s22  ;;  %s2425_s1 = sld [smem:[#allocation2 + $0x61]] }
  0xcd   : > { %3161 = sst [smem:[#allocation78_spill]] %s2367_s15  ;;  %s2427_s26 = sld [smem:[#allocation2 + $0x4a]] }
  0xce   : > { %3162 = sst [smem:[#allocation79_spill]] %s2369_s23  ;;  %s3193_s16 = sld [smem:[#allocation45_spill]] }
  0xcf   : > { %3163 = sst [smem:[#allocation80_spill]] %s2396_s11  ;;  %s3192_s11 = sld [smem:[#allocation55_spill]] }
  0xd0   : > { %3164 = sst [smem:[#allocation81_spill]] %s2400_s29  ;;  %s3191_s29 = sld [smem:[#allocation50_spill]] }
  0xd1   : > { %s3196_s0 = sld [smem:[#allocation57_spill]]  ;;  %s3199_s7 = sld [smem:[#allocation59_spill]] }
  0xd2   : > { %s3200_s20 = sld [smem:[#allocation64_spill]]  ;;  %s3201_s27 = sld [smem:[#allocation58_spill]] }
  0xd3   : > { %3165 = sst [smem:[#allocation82_spill]] %s2427_s26  ;;  %s3202_s6 = sld [smem:[#allocation60_spill]] }
  0xd4   : > { %s3203_s23 = sld [smem:[#allocation52_spill]]  ;;  %s3219_s22 = sld [smem:[#allocation70_spill]] }
  0xd5   : > { %s3220_s24 = sld [smem:[#allocation68_spill]]  ;;  %s3222_s26 = sld [smem:[#allocation69_spill]] }
  0xd6   : > { %s3223_s15 = sld [smem:[#allocation71_spill]]  ;;  %s3239_s12 = sld [smem:[#allocation61_spill]] }
  0xd7   : > { %s3242_s18 = sld [smem:[#allocation72_spill]]  ;;  %s3246_s17 = sld [smem:[#allocation53_spill]] }
  0xfa   : > { %v2217_v58 = vpop.permute.xlu0 %248 }
  0xfc   : > { %v2236_v4 = vpop.permute.xlu1 %252 }
  0xfe   : > { %v2265_v57 = vpop.permute.xlu0 %342 }
 0x100   : > { %v2284_v22 = vpop.permute.xlu1 %344 }
 0x102   : > { %v2305_v18 = vpop.permute.xlu0 %296 }
 0x104   : > { %v2328_v26 = vpop.permute.xlu1 %298 }
 0x106   : > { %v251_v27 = vpop.permute.xlu0 %250 }
 0x107   : > { %v260_v21 = vsel %vm258_vm1, %v251_v27, %v2236_v4  ;;  %v261_v35 = vsel %vm258_vm1, %v2217_v58, %v251_v27 }
 0x108   : > { %v255_v10 = vpop.permute.xlu1 %254 }
 0x109   : > { %v259_v24 = vsel %vm258_vm1, %v2236_v4, %v255_v10  ;;  %v262_v11 = vsel %vm258_vm1, %v255_v10, %v2217_v58  ;;  %vm488_vm1 = vcmp.lt.s32.totalorder %v2174_v37, 125 }
 0x10a   : > { %v270_v31 = vcombine.low %v262_v11, %v261_v35  ;;  %v271_v1 = vcombine.low %v260_v21, %v259_v24  ;;  %v347_v20 = vpop.permute.xlu0 %346 }
 0x10c   : > { %v278_v4 = vrot.slane %v270_v31, %v2168_v36  ;;  %v285_v58 = vrot.slane %v271_v1, %v2168_v36  ;;  %v349_v24 = vpop.permute.xlu1 %348  ;;  %v353_v1 = vsel %vm350_vm2, %v2265_v57, %v2284_v22  ;;  %v352_v31 = vsel %vm350_vm2, %v2284_v22, %v347_v20 }
 0x10d   : > { %v351_v35 = vsel %vm350_vm2, %v347_v20, %v349_v24  ;;  %v354_v21 = vsel %vm350_vm2, %v349_v24, %v2265_v57  ;;  %v1127_v22 = vstv %s2351_s28  ;;  %v2441_v57 = vrot.slane %v895_v34, %v2168_v36  ;;  %s3245_s28 = sld [smem:[#allocation48_spill]] }
 0x10e   : > { %v286_v7 = vcombine.low %v278_v4, %v285_v58  ;;  %v362_v11 = vcombine.low %v354_v21, %v353_v1  ;;  %v363_v29 = vcombine.low %v352_v31, %v351_v35  ;;  %v301_v27 = vpop.permute.xlu0 %300  ;;  %v1129_v31 = vstv %s2375_s30  ;;  %s3240_s30 = sld [smem:[#allocation63_spill]] }
 0x10f   : > { %v307_v35 = vsel %vm304_vm5, %v2305_v18, %v2328_v26  ;;  %v306_v32 = vsel %vm304_vm5, %v2328_v26, %v301_v27  ;;  %vm447_vm2 = vcmp.ge.s32.totalorder %v2295_v30, 4294967294 }
 0x110   : > { %v293_v4 = vrot.slane %v286_v7, %v2168_v36  ;;  %v370_v58 = vrot.slane %v362_v11, %v2168_v36  ;;  %v377_v24 = vrot.slane %v363_v29, %v2168_v36  ;;  %v303_v1 = vpop.permute.xlu1 %302  ;;  %vm449_vm7 = vmand %vm447_vm2, %vm448_vm3  ;;  %vm1253_vm3 = vcmp.lt.s32.totalorder %v2174_v37, 80 }
 0x111   : > { %v305_v33 = vsel %vm304_vm5, %v301_v27, %v303_v1  ;;  %v308_v34 = vsel %vm304_vm5, %v303_v1, %v2305_v18  ;;  %vm493_vm5 = vcmp.ge.s32.totalorder %v2295_v30, 4294967293  ;;  %v3218_v30 = vstv %s2247_s2  ;;  %s3226_s2 = sld [smem:[#allocation54_spill]] }
 0x112   : > { %v2459_v7 = vsel %vm265_vm11, %v293_v4, 0.0  ;;  %v378_v29 = vcombine.low %v370_v58, %v377_v24  ;;  %v316_v11 = vcombine.low %v308_v34, %v307_v35  ;;  %v317_v21 = vcombine.low %v306_v32, %v305_v33  ;;  %v389_v8 = vpop.permute.xlu0 %388  ;;  %vm495_vm8 = vmand %vm493_vm5, %vm494_vm6 }
 0x113   : > { %v2462_v10 = vrot.slane %v2459_v7, 2  ;;  %v530_v33 = vmul.f32 %v529_v38, %v2459_v7  ;;  %v758_v26 = vmul.f32 %v757_v39, %v2459_v7  ;;  %v654_v32 = vmul.f32 %v653_v40, %v2459_v7 }
 0x114   : > { %v385_v58 = vrot.slane %v378_v29, %v2168_v36  ;;  %v324_v24 = vrot.slane %v316_v11, %v2168_v36  ;;  %v331_v1 = vrot.slane %v317_v21, %v2168_v36  ;;  %v391_v35 = vpop.permute.xlu1 %390  ;;  %v953_v29 = vmul.f32 %v952_v53, %v2459_v7 }
 0x115   : > { %v399_v18 = vsel %vm396_vm10, %v389_v8, %v391_v35  ;;  %v535_v39 = vmul.f32 %v2462_v10, %v531_v43  ;;  %v760_v27 = vmul.f32 %v759_v46, %v2462_v10  ;;  %vm744_vm11 = vcmp.lt.s32.totalorder %v2174_v37, 32 }
 0x116   : > { %v2491_v11 = vsel %vm2468_vm12, %v385_v58, 0.0  ;;  %v332_v21 = vcombine.low %v324_v24, %v331_v1  ;;  %v393_v4 = vpop.permute.xlu0 %392  ;;  %vm851_vm12 = vcmp.ge.s32.totalorder %v2174_v37, 16 }
 0x117   : > { %v2500_v38 = vrot.slane %v2491_v11, 2  ;;  %v398_v58 = vsel %vm396_vm10, %v391_v35, %v393_v4 }
 0x118   : > { %v339_v40 = vrot.slane %v332_v21, %v2168_v36  ;;  %v408_v24 = vcombine.low %v399_v18, %v398_v58  ;;  %v395_v1 = vpop.permute.xlu1 %394  ;;  %v656_v21 = vmul.f32 %v655_v48, %v2462_v10  ;;  %v536_v48 = vadd.f32 %v535_v39, %v530_v33 }
 0x119   : > { %v397_v34 = vsel %vm396_vm10, %v393_v4, %v395_v1  ;;  %v400_v35 = vsel %vm396_vm10, %v395_v1, %v389_v8  ;;  %v557_v43 = vmul.f32 %v2500_v38, %v553_v51  ;;  %v776_v53 = vmul.f32 %v775_v54, %v2500_v38 }
 0x11a   : > { %v2530_v18 = vsel %vm311_vm0, %v339_v40, 0.0  ;;  %v409_v58 = vcombine.low %v397_v34, %v400_v35  ;;  %v435_v46 = vpop.permute.xlu0 %434  ;;  %v955_v4 = vmul.f32 %v954_v0, %v2462_v10  ;;  %v552_v51 = vmul.f32 %v551_v50, %v2491_v11 }
 0x11b   : > { %v2539_v8 = vrot.slane %v2530_v18, 2  ;;  %v2548_v34 = vmul.f32 %v1058_v3, %v2459_v7  ;;  %v416_v54 = vrot.slane %v408_v24, %v2168_v36  ;;  %v761_v33 = vadd.f32 %v760_v27, %v758_v26 }
 0x11c   : > { %v423_v0 = vrot.slane %v409_v58, %v2168_v36  ;;  %v437_v40 = vpop.permute.xlu1 %436  ;;  %v774_v50 = vmul.f32 %v773_v52, %v2491_v11  ;;  %v541_v3 = vmul.f32 %v540_v41, %v2530_v18  ;;  %v558_v24 = vadd.f32 %v557_v43, %v552_v51 }
 0x11d   : > { %v546_v39 = vmul.f32 %v2539_v8, %v542_v42  ;;  %v768_v1 = vmul.f32 %v767_v60, %v2539_v8  ;;  %v766_v20 = vmul.f32 %v765_v45, %v2530_v18  ;;  %v672_v52 = vmul.f32 %v671_v63, %v2500_v38 }
 0x11e   : > { %v424_v35 = vcombine.low %v416_v54, %v423_v0  ;;  %v439_v58 = vpop.permute.xlu0 %438  ;;  %v777_v26 = vadd.f32 %v776_v53, %v774_v50  ;;  %v445_v41 = vsel %vm442_vm15, %v435_v46, %v437_v40  ;;  %v664_v60 = vmul.f32 %v663_v49, %v2539_v8 }
 0x11f   : > { %v444_v42 = vsel %vm442_vm15, %v437_v40, %v439_v58  ;;  %v670_v45 = vmul.f32 %v669_v62, %v2491_v11  ;;  %v547_v53 = vadd.f32 %v546_v39, %v541_v3  ;;  %v769_v51 = vadd.f32 %v768_v1, %v766_v20 }
 0x120   : > { %v431_v27 = vrot.slane %v424_v35, %v2168_v36  ;;  %v454_v63 = vcombine.low %v445_v41, %v444_v42  ;;  %v441_v43 = vpop.permute.xlu1 %440  ;;  %v662_v40 = vmul.f32 %v661_v61, %v2530_v18  ;;  %v559_v41 = vadd.f32 %v558_v24, %v536_v48 }
 0x121   : > { %v443_v54 = vsel %vm442_vm15, %v439_v58, %v441_v43  ;;  %v446_v0 = vsel %vm442_vm15, %v441_v43, %v435_v46  ;;  %v673_v50 = vadd.f32 %v672_v52, %v670_v45  ;;  %v657_v3 = vadd.f32 %v656_v21, %v654_v32 }
 0x122   : > { %v2594_v49 = vsel %vm403_vm4, %v431_v27, 0.0  ;;  %v455_v62 = vcombine.low %v443_v54, %v446_v0  ;;  %v481_v35 = vpop.permute.xlu0 %480  ;;  %v778_v39 = vadd.f32 %v777_v26, %v761_v33  ;;  %v665_v1 = vadd.f32 %v664_v60, %v662_v40 }
 0x123   : > { %v2597_v20 = vrot.slane %v2594_v49, 2  ;;  %v956_v46 = vadd.f32 %v955_v4, %v953_v29  ;;  %v462_v61 = vrot.slane %v454_v63, %v2168_v36  ;;  %v2606_v32 = vadd.f32 %v586_v47, %v547_v53 }
 0x124   : > { %v469_v58 = vrot.slane %v455_v62, %v2168_v36  ;;  %v483_v52 = vpop.permute.xlu1 %482  ;;  %v2611_v29 = vadd.f32 %v805_v13, %v769_v51  ;;  %v592_v21 = vmul.f32 %v591_v5, %v2594_v49  ;;  %v811_v48 = vmul.f32 %v810_v14, %v2594_v49 }
 0x125   : > { %v597_v4 = vmul.f32 %v2597_v20, %v593_v9  ;;  %v674_v33 = vadd.f32 %v673_v50, %v657_v3  ;;  %v491_v47 = vsel %vm488_vm1, %v481_v35, %v483_v52  ;;  %v813_v55 = vmul.f32 %v812_v59, %v2597_v20 }
 0x126   : > { %v470_v44 = vcombine.low %v462_v61, %v469_v58  ;;  %v485_v24 = vpop.permute.xlu0 %484  ;;  %v963_v5 = vmul.f32 %v962_v16, %v2539_v8  ;;  %v709_v14 = vmul.f32 %v708_v2, %v2597_v20  ;;  %v971_v26 = vmul.f32 %v970_v17, %v2500_v38 }
 0x127   : > { %v490_v9 = vsel %vm488_vm1, %v483_v52, %v485_v24  ;;  %v598_v13 = vadd.f32 %v597_v4, %v592_v21  ;;  %v3194_v16 = vrot.slane %v2243_v6, %v2168_v36  ;;  %v3195_v27 = vstv %s3191_s29  ;;  %s3247_s29 = sld [smem:[#allocation78_spill]] }
 0x128   : > { %v477_v59 = vrot.slane %v470_v44, %v2168_v36  ;;  %v500_v42 = vcombine.low %v491_v47, %v490_v9  ;;  %v487_v60 = vpop.permute.xlu1 %486  ;;  %v961_v63 = vmul.f32 %v3195_v27, %v2530_v18  ;;  %v3197_v43 = vstv %s3192_s11  ;;  %s1772_s11 = smov 48  }
 0x129   : > { %v2646_v45 = vadd.f32 %v3194_v16, %v665_v1  ;;  %v489_v2 = vsel %vm488_vm1, %v485_v24, %v487_v60  ;;  %v492_v17 = vsel %vm488_vm1, %v487_v60, %v481_v35  ;;  %v707_v53 = vmul.f32 %v3197_v43, %v2594_v49 }
 0x12a   : > { %v3198_v6 = vstv %s3193_s16  ;;  %v2661_v54 = vsel %vm449_vm7, %v477_v59, 0.0  ;;  %v501_v0 = vcombine.low %v489_v2, %v492_v17  ;;  %v814_v40 = vadd.f32 %v813_v55, %v811_v48  ;;  %s2802_s16 = sld [smem:[#allocation2 + $0x4c]] }
 0x12b   : > { %v969_v51 = vmul.f32 %v3198_v6, %v2491_v11  ;;  %v2663_v50 = vadd.f32 %v963_v5, %v961_v63  ;;  %v2666_v62 = vrot.slane %v2661_v54, 2  ;;  %v599_v35 = vadd.f32 %v598_v13, %v559_v41 }
 0x12c   : > { %v710_v3 = vadd.f32 %v709_v14, %v707_v53  ;;  %v508_v61 = vrot.slane %v500_v42, %v2168_v36  ;;  %v515_v58 = vrot.slane %v501_v0, %v2168_v36  ;;  %v3204_v52 = vstv %s2181_s3  ;;  %s3212_s3 = sld [smem:[#allocation66_spill]] }
 0x12d   : > { %v972_v1 = vadd.f32 %v971_v26, %v969_v51  ;;  %v1006_v21 = vmul.f32 %v3204_v52, %v2594_v49  ;;  %v3205_v4 = vstv %s2202_s5  ;;  %v3206_v44 = vstv %s3196_s0  ;;  %s3217_s5 = sld [smem:[#allocation67_spill]]  ;;  %s3256_s0 = sld [smem:[#allocation80_spill]] }
 0x12e   : > { %v1008_v48 = vmul.f32 %v3205_v4, %v2597_v20  ;;  %v603_v47 = vmul.f32 %v3206_v44, %v2661_v54  ;;  %v3207_v24 = vstv %s2159_s8  ;;  %v3208_v55 = vstv %s3199_s7  ;;  %s3215_s8 = sld [smem:[#allocation62_spill]] }
 0x12f   : > { %v608_v41 = vmul.f32 %v2666_v62, %v3207_v24  ;;  %v821_v5 = vmul.f32 %v3208_v55, %v2666_v62  ;;  %v3209_v9 = vstv %s3200_s20  ;;  %v516_v14 = vcombine.low %v508_v61, %v515_v58  ;;  %s3257_s7 = sld [smem:[#allocation46_spill]]  ;;  %s3259_s20 = sld [smem:[#allocation73_spill]] }
 0x130   : > { %v717_v13 = vmul.f32 %v3209_v9, %v2666_v62  ;;  %v3210_v26 = vstv %s3201_s27  ;;  %v1009_v42 = vadd.f32 %v1008_v48, %v1006_v21  ;;  %v3211_v60 = vstv %s3154_s13  ;;  %s3216_s13 = sld [smem:[#allocation65_spill]]  ;;  %s1773_s27 = smov 16  }
 0x131   : > { %v819_v59 = vmul.f32 %v3210_v26, %v2661_v54  ;;  %v1016_v16 = vmul.f32 %v3211_v60, %v2666_v62  ;;  %v609_v27 = vadd.f32 %v608_v41, %v603_v47  ;;  %v3213_v63 = vstv %s3202_s6  ;;  %s3260_s6 = sld [smem:[#allocation77_spill]] }
 0x132   : > { %v715_v2 = vmul.f32 %v3213_v63, %v2661_v54  ;;  %v973_v17 = vadd.f32 %v972_v1, %v956_v46  ;;  %v3214_v43 = vstv %s3203_s23  ;;  %v523_v6 = vrot.slane %v516_v14, %v2168_v36  ;;  %s3261_s23 = sld [smem:[#allocation79_spill]] }
 0x133   : > { %v1061_v53 = vmul.f32 %v3214_v43, %v2462_v10  ;;  %v815_v51 = vadd.f32 %v814_v40, %v778_v39  ;;  %v711_v0 = vadd.f32 %v710_v3, %v674_v33  ;;  %v1014_v61 = vmul.f32 %v3218_v30, %v2661_v54 }
 0x134   : > { %v822_v58 = vadd.f32 %v821_v5, %v819_v59  ;;  %v718_v52 = vadd.f32 %v717_v13, %v715_v2  ;;  %v1010_v21 = vadd.f32 %v1009_v42, %v973_v17  ;;  %v3221_v46 = vstv %s2215_s10  ;;  %s2739_s10 = sld [smem:[#allocation2 + $0x1a]] }
 0x135   : > { %v1067_v1 = vmul.f32 %v3221_v46, %v2530_v18  ;;  %v2711_v4 = vsel %vm495_vm8, %v523_v6, 0.0  ;;  %v1017_v39 = vadd.f32 %v1016_v16, %v1014_v61  ;;  %v3224_v33 = vstv %s2225_s21  ;;  %s3243_s21 = sld [smem:[#allocation74_spill]] }
 0x136   : > { %v1069_v40 = vmul.f32 %v3224_v33, %v2539_v8  ;;  %v3225_v3 = vstv %s3212_s3  ;;  %v2720_v44 = vrot.slane %v2711_v4, 2  ;;  %v610_v47 = vadd.f32 %v609_v27, %v2606_v32  ;;  %s3265_s3 = sld [smem:[#allocation76_spill]] }
 0x137   : > { %v1077_v48 = vmul.f32 %v3225_v3, %v2500_v38  ;;  %v1062_v24 = vadd.f32 %v1061_v53, %v2548_v34  ;;  %v3227_v41 = vstv %s3215_s8  ;;  %v3228_v5 = vstv %s3216_s13  ;;  %s1774_s8 = smov 32   ;;  %s1775_s13 = smov 112  }
 0x138   : > { %v1075_v55 = vmul.f32 %v3227_v41, %v2491_v11  ;;  %v614_v9 = vmul.f32 %v3228_v5, %v2711_v4  ;;  %v3229_v13 = vstv %s3217_s5  ;;  %v3230_v26 = vstv %s3219_s22  ;;  %s1776_s5 = smov 96   ;;  %s1777_s22 = smov 80  }
 0x139   : > { %v827_v14 = vmul.f32 %v3229_v13, %v2711_v4  ;;  %v723_v59 = vmul.f32 %v3230_v26, %v2711_v4  ;;  %v3231_v42 = vstv %s2278_s14  ;;  %v3232_v32 = vstv %s3220_s24  ;;  %s2759_s14 = sld [smem:[#allocation2 + $0x4b]]  ;;  %s2894_s24 = sld [smem:[#allocation2 + $0x62]] }
 0x13a   : > { %v1022_v60 = vmul.f32 %v3231_v42, %v2711_v4  ;;  %v619_v34 = vmul.f32 %v2720_v44, %v3232_v32  ;;  %v3233_v16 = vstv %s3222_s26  ;;  %v3234_v63 = vstv %s3223_s15  ;;  %s3279_s26 = sld [smem:[#allocation18_spill]]  ;;  %s3280_s15 = sld [smem:[#allocation23_spill]] }
 0x13b   : > { %v829_v27 = vmul.f32 %v3233_v16, %v2720_v44  ;;  %v725_v2 = vmul.f32 %v3234_v63, %v2720_v44  ;;  %v3235_v17 = vstv %s2291_s25  ;;  %v1070_v53 = vadd.f32 %v1069_v40, %v1067_v1  ;;  %s3244_s25 = sld [smem:[#allocation56_spill]] }
 0x13c   : > { %v1024_v43 = vmul.f32 %v3235_v17, %v2720_v44  ;;  %v1078_v6 = vadd.f32 %v1077_v48, %v1075_v55  ;;  %v3236_v30 = vstv %s3226_s2  ;;  %v3237_v46 = vstv %s2272_s9  ;;  %s2779_s9 = sld [smem:[#allocation2 + $0x1b]]  ;;  %s3281_s2 = sld [smem:[#allocation24_spill]] }
 0x13d   : > { %v1112_v61 = vmul.f32 %v3236_v30, %v2594_v49  ;;  %v1114_v33 = vmul.f32 %v3237_v46, %v2597_v20  ;;  %v620_v3 = vadd.f32 %v619_v34, %v614_v9  ;;  %v830_v41 = vadd.f32 %v829_v27, %v827_v14 }
 0x13e   : > { %v726_v5 = vadd.f32 %v725_v2, %v723_v59  ;;  %v1025_v13 = vadd.f32 %v1024_v43, %v1022_v60  ;;  %v1120_v42 = vmul.f32 %v1119_v19, %v2661_v54  ;;  %v1122_v1 = vmul.f32 %v1121_v15, %v2666_v62 }
 0x13f   : > { %v1115_v26 = vadd.f32 %v1114_v33, %v1112_v61  ;;  %v1130_v40 = vmul.f32 %v1129_v31, %v2720_v44  ;;  %v621_v48 = vadd.f32 %v620_v3, %v599_v35  ;;  %v831_v55 = vadd.f32 %v830_v41, %v815_v51 }
 0x140   : > { %v727_v32 = vadd.f32 %v726_v5, %v711_v0  ;;  %v1128_v9 = vmul.f32 %v1127_v22, %v2711_v4  ;;  %v3238_v14 = vrot.slane %v2259_v56, %v2168_v36  ;;  %v1026_v60 = vadd.f32 %v1025_v13, %v1010_v21 }
 0x141   : > { %v1079_v19 = vadd.f32 %v1078_v6, %v1062_v24  ;;  %v1123_v34 = vadd.f32 %v1122_v1, %v1120_v42  ;;  %v622_v15 = vadd.f32 %v621_v48, %v610_v47  ;;  %v823_v31 = vadd.f32 %v822_v58, %v2611_v29 }
 0x142   : > { %v1002_v59 = vadd.f32 %v3238_v14, %v2663_v50  ;;  %v719_v35 = vadd.f32 %v718_v52, %v2646_v45  ;;  %v1131_v51 = vadd.f32 %v1130_v40, %v1128_v9  ;;  %v3241_v22 = vrot.slane %v2322_v25, %v2168_v36 }
 0x143   : > { %v1116_v50 = vadd.f32 %v1115_v26, %v1079_v19  ;;  %v922_v21 = vstv %s2739_s10  ;;  %v631_v47 = vrot.slane %v622_v15, %v2344_v23  ;;  %v627_v29 = vrot.slane %v622_v15, %v2341_v12  ;;  %s3282_s10 = sld [smem:[#allocation22_spill]] }
 0x144   : > { %v1018_v0 = vadd.f32 %v1017_v39, %v1002_v59  ;;  %v1108_v56 = vadd.f32 %v3241_v22, %v1070_v53  ;;  %v832_v45 = vadd.f32 %v831_v55, %v823_v31  ;;  %v728_v58 = vadd.f32 %v727_v32, %v719_v35 }
 0x145   : > { %v3248_v25 = vstv %s3239_s12  ;;  %v3249_v16 = vstv %s3240_s30  ;;  %636 = vrot.lane.b32.xlu1 %v631_v47, %s1772_s11  ;;  %634 = vrot.lane.b32.xlu0 %v627_v29, %s1772_s11  ;;  %v1132_v63 = vadd.f32 %v1131_v51, %v1116_v50  ;;  %vm638_vm10 = vcmp.lt.s32.totalorder %v2174_v37, 48  ;;  %s3283_s12 = sshll.u32 %s3280_s15, 3  ;;  %s1778_s11 = smov [#allocation9]  }
 0x146   : > { %v2787_v52 = vadd.f32 %v1026_v60, %v1018_v0  ;;  %v1124_v39 = vadd.f32 %v1123_v34, %v1108_v56  ;;  %v1163_v24 = vmul.f32 %v3248_v25, %v2459_v7  ;;  %v1165_v27 = vmul.f32 %v3249_v16, %v2462_v10  ;;  %s211_s30 = scalar_lea.vmem [#allocation9], %s3283_s12 }
 0x147   : > { %v3250_v2 = vstv %s3242_s18  ;;  %v3251_v43 = vstv %s3243_s21  ;;  %v924_v6 = vstv %s2759_s14  ;;  %v3252_v30 = vstv %s3244_s25  ;;  %s1524_s14 = sshll.u32 %s3279_s26, 7  ;;  %s3284_s25 = sld [smem:[#allocation86_spill]] }
 0x148   : > { %v1171_v17 = vmul.f32 %v3250_v2, %v2530_v18  ;;  %v1173_v53 = vmul.f32 %v3251_v43, %v2539_v8  ;;  %v1179_v61 = vmul.f32 %v3252_v30, %v2491_v11  ;;  %v3253_v46 = vstv %s3245_s28 }
 0x149   : > { %v1181_v33 = vmul.f32 %v3253_v46, %v2500_v38  ;;  %v3254_v3 = vstv %s3246_s17  ;;  %v3255_v5 = vstv %s3247_s29  ;;  %v841_v26 = vrot.slane %v832_v45, %v2344_v23  ;;  %s1297_s17 = scalar_lea.sflag [#allocation4], %s3280_s15  ;;  %p3285_p4 = scmp.ne.s32.totalorder %s3282_s10, 0 }
 0x14a   : > { %v1216_v41 = vmul.f32 %v3254_v3, %v2594_v49  ;;  %v1218_v13 = vmul.f32 %v3255_v5, %v2597_v20  ;;  %v837_v42 = vrot.slane %v832_v45, %v2341_v12  ;;  %v737_v1 = vrot.slane %v728_v58, %v2344_v23 }
 0x14b   : > { %v733_v40 = vrot.slane %v728_v58, %v2341_v12  ;;  %v1166_v48 = vadd.f32 %v1165_v27, %v1163_v24  ;;  %v1182_v55 = vadd.f32 %v1181_v33, %v1179_v61  ;;  %v3258_v9 = vstv %s2408_s19  ;;  %846 = vrot.lane.b32.xlu1 %v841_v26, %s1773_s27  ;;  %s3264_s19 = sld [smem:[#allocation75_spill]] }
 0x14c   : > { %v1219_v32 = vadd.f32 %v1218_v13, %v1216_v41  ;;  %v1226_v14 = vmul.f32 %v3258_v9, %v2666_v62  ;;  %844 = vrot.lane.b32.xlu0 %v837_v42, %s1773_s27  ;;  %v1036_v59 = vrot.slane %v2787_v52, %v2344_v23  ;;  %v3262_v60 = vstv %s2410_s4  ;;  %s3268_s4 = sld [smem:[#allocation81_spill]] }
 0x14d   : > { %v1232_v19 = vmul.f32 %v3262_v60, %v2711_v4  ;;  %v3263_v34 = vstv %s2425_s1  ;;  %v930_v31 = vstv %s2779_s9  ;;  %v1032_v35 = vrot.slane %v2787_v52, %v2341_v12  ;;  %s3270_s1 = sld [smem:[#allocation82_spill]]  ;;  %s1311_s9 = sshll.u32 %s211_s30, 4  ;;  %s2928_s9 = int_to_ptr.vmem [resolvable:$true] %s1311_s9 }
 0x14e   : > { %v1234_v15 = vmul.f32 %v3263_v34, %v2720_v44  ;;  %v1174_v51 = vadd.f32 %v1173_v53, %v1171_v17  ;;  %v1183_v0 = vadd.f32 %v1182_v55, %v1166_v48  ;;  %v3266_v22 = vstv %s3256_s0  ;;  %s2926_s28 = scalar_lea.hbm %s3284_s25, %s1524_s14  ;;  %s1686_s29 = scalar_lea.vmem %s2928_s9, 128 }
 0x14f   : > { %v1224_v56 = vmul.f32 %v3266_v22, %v2661_v54  ;;  %v1133_v50 = vadd.f32 %v1132_v63, %v1124_v39  ;;  %v3267_v29 = vstv %s3257_s7  ;;  %v3269_v58 = vstv %s3259_s20  ;;  %742 = vrot.lane.b32.xlu1 %v737_v1, %s1774_s8  ;;  %p1687_p11 = scmp.ne.s32.totalorder %s2928_s9, %s1686_s29 }
 0x150   : > { %v1235_v47 = vadd.f32 %v1234_v15, %v1232_v19  ;;  %v862_v45 = vmul.f32 %v3267_v29, %v2459_v7  ;;  %v864_v25 = vmul.f32 %v3269_v58, %v2462_v10  ;;  %v1220_v24 = vadd.f32 %v1219_v32, %v1183_v0  ;;  %740 = vrot.lane.b32.xlu0 %v733_v40, %s1774_s8 }
 0x151   : > { %v1227_v52 = vadd.f32 %v1226_v14, %v1224_v56  ;;  %v3271_v16 = vstv %s3260_s6  ;;  %v3272_v2 = vstv %s3261_s23  ;;  %v3273_v63 = vstv %s3264_s19  ;;  %p1688_p6 = pnand %p1687_p11, %p3285_p4 }
 0x152   : > { %v870_v27 = vmul.f32 %v3271_v16, %v2530_v18  ;;  %v872_v17 = vmul.f32 %v3272_v2, %v2539_v8  ;;  %v865_v39 = vadd.f32 %v864_v25, %v862_v45  ;;  %v878_v43 = vmul.f32 %v3273_v63, %v2491_v11 }
 0x153   : > { %v3274_v7 = vstv %s3265_s3  ;;  %v932_v30 = vstv %s2802_s16  ;;  %v3275_v10 = vrot.slane %v2365_v28, %v2168_v36  ;;  %v3276_v18 = vstv %s3268_s4  ;;  %1041 = vrot.lane.b32.xlu1 %v1036_v59, %s1775_s13  ;;  %p1689_p9 = pneg %p1688_p6  ;;  %s1690_s16 = sshll.u32 %s1778_s11, 4  ;;  %s1691_s16 = int_to_ptr.vmem [resolvable:$false] %s1690_s16 }
 0x154   : > { %v880_v53 = vmul.f32 %v3274_v7, %v2500_v38  ;;  %v873_v46 = vadd.f32 %v872_v17, %v870_v27  ;;  %v915_v33 = vmul.f32 %v3276_v18, %v2594_v49  ;;  %v3277_v8 = vstv %s3270_s1  ;;  %1039 = vrot.lane.b32.xlu0 %v1032_v35, %s1775_s13  ;;  %s1692_s0 = scalar_lea.vmem %s1691_s16, 256  ;;  %p1693_p12 = scmp.lt.s32.totalorder %s2928_s9, %s1691_s16 }
 0x155   : > { %v1212_v61 = vadd.f32 %v3275_v10, %v1174_v51  ;;  %v917_v3 = vmul.f32 %v3277_v8, %v2597_v20  ;;  %v1236_v41 = vadd.f32 %v1235_v47, %v1220_v24  ;;  %v923_v13 = vmul.f32 %v922_v21, %v2661_v54  ;;  %p1694_p7 = scmp.lt.s32.totalorder %s1692_s0, %s1686_s29 }
 0x156   : > { %v881_v5 = vadd.f32 %v880_v53, %v878_v43  ;;  %v925_v11 = vmul.f32 %v924_v6, %v2666_v62  ;;  %v3278_v38 = vrot.slane %v2441_v57, %v2168_v36  ;;  %v931_v28 = vmul.f32 %v930_v31, %v2711_v4 }
 0x157   : > { %v918_v42 = vadd.f32 %v917_v3, %v915_v33  ;;  %v933_v1 = vmul.f32 %v932_v30, %v2720_v44  ;;  %v1228_v49 = vadd.f32 %v1227_v52, %v1212_v61  ;;  %v1142_v48 = vrot.slane %v1133_v50, %v2344_v23  ;;  %p1695_p13 = por %p1694_p7, %p1693_p12 }
 0x158   : > { %v911_v26 = vadd.f32 %v3278_v38, %v873_v46  ;;  %v882_v20 = vadd.f32 %v881_v5, %v865_v39  ;;  %v926_v40 = vadd.f32 %v925_v11, %v923_v13  ;;  %v1138_v62 = vrot.slane %v1133_v50, %v2341_v12 }
 0x159   : > { %v934_v54 = vadd.f32 %v933_v1, %v931_v28  ;;  %v1237_v21 = vadd.f32 %v1236_v41, %v1228_v49  ;;  %1147 = vrot.lane.b32.xlu1 %v1142_v48, %s1776_s5  ;;  %v526_v15 = vadd.s32 128, %v2174_v37  ;;  %vm747_vm15 = vcmp.ge.s32.totalorder %v2174_v37, 32  ;;  %p1696_p3 = pnand %p1695_p13, %p1689_p9 }
 0x15a   : > { %v919_v6 = vadd.f32 %v918_v42, %v882_v20  ;;  %v927_v36 = vadd.f32 %v926_v40, %v911_v26  ;;  %1145 = vrot.lane.b32.xlu0 %v1138_v62, %s1776_s5  ;;  %vm1149_vm0 = vcmp.lt.s32.totalorder %v2174_v37, 96  ;;  %v1267_v13 = vstv %s2894_s24 }
 0x15b   : > { %v1246_v4 = vrot.slane %v1237_v21, %v2344_v23  ;;  %v1242_v44 = vrot.slane %v1237_v21, %v2341_v12  ;;  %vm1049_vm1 = vcmp.lt.s32.totalorder %v526_v15, 240  ;;  %vm1153_vm2 = vcmp.lt.s32.totalorder %v526_v15, 224 }
 0x15c   : > { %v935_v57 = vadd.f32 %v934_v54, %v919_v6  ;;  %vm1257_vm4 = vcmp.lt.s32.totalorder %v526_v15, 208 }
 0x15d   : > { %1251 = vrot.lane.b32.xlu1 %v1246_v4, %s1777_s22 }
 0x15e   : > { %v936_v55 = vadd.f32 %v935_v57, %v927_v36  ;;  %1249 = vrot.lane.b32.xlu0 %v1242_v44, %s1777_s22  ;;  %v1614_v57 = vld [vmem:[%s3281_s2] sm:$0xff] }
 0x160   : > { %v945_v32 = vrot.slane %v936_v55, %v2344_v23  ;;  %v941_v47 = vrot.slane %v936_v55, %v2341_v12 }
 0x1b7   : > { %v637_v9 = vpop.permute.xlu1 %636  ;;  %v635_v14 = vpop.permute.xlu0 %634 }
 0x1b8   : > { %v640_v51 = vsel %vm638_vm10, %v637_v9, %v635_v14  ;;  %v639_v16 = vsel %vm638_vm10, %v635_v14, %v637_v9 }
 0x1b9   : > { %v647_v58 = vsel %vm641_vm14, %v640_v51, 0.0 }
 0x1bd   : > { %v847_v59 = vpop.permute.xlu1 %846 }
 0x1be   : > { %v845_v60 = vpop.permute.xlu0 %844 }
 0x1bf   : > { %v850_v31 = vsel %vm848_vm9, %v847_v59, %v845_v60  ;;  %v849_v50 = vsel %vm848_vm9, %v845_v60, %v847_v59 }
 0x1c0   : > { %v855_v22 = vsel %vm851_vm12, %v850_v31, 0.0  ;;  %v858_v39 = vadd.f32 %v849_v50, %v639_v16 }
 0x1c1   : > { %v743_v19 = vpop.permute.xlu1 %742  ;;  %v857_v27 = vadd.f32 %v855_v22, %v647_v58 }
 0x1c2   : > { %v741_v34 = vpop.permute.xlu0 %740 }
 0x1c3   : > { %v746_v0 = vsel %vm744_vm11, %v743_v19, %v741_v34  ;;  %v745_v2 = vsel %vm744_vm11, %v741_v34, %v743_v19 }
 0x1c4   : > { %v751_v25 = vsel %vm747_vm15, %v746_v0, 0.0  ;;  %v949_v61 = vadd.f32 %v945_v32, %v745_v2 }
 0x1c5   : > { %v1042_v23 = vpop.permute.xlu1 %1041  ;;  %v948_v43 = vadd.f32 %v941_v47, %v751_v25 }
 0x1c6   : > { %v1040_v35 = vpop.permute.xlu0 %1039 }
 0x1c7   : > { %v1045_v56 = vsel %vm1043_vm13, %v1042_v23, %v1040_v35  ;;  %v1044_v24 = vsel %vm1043_vm13, %v1040_v35, %v1042_v23 }
 0x1c8   : > { %v1053_v17 = vsel %vm1049_vm1, %v1045_v56, 0.0  ;;  %v1054_v7 = vadd.f32 %v1044_v24, %v857_v27 }
 0x1c9   : > { %v1055_v46 = vadd.f32 %v1053_v17, %v858_v39 }
 0x1cb   : > { %v1148_v29 = vpop.permute.xlu1 %1147 }
 0x1cc   : > { %v1146_v45 = vpop.permute.xlu0 %1145 }
 0x1cd   : > { %v1151_v52 = vsel %vm1149_vm0, %v1148_v29, %v1146_v45  ;;  %v1150_v63 = vsel %vm1149_vm0, %v1146_v45, %v1148_v29 }
 0x1ce   : > { %v1157_v53 = vsel %vm1153_vm2, %v1151_v52, 0.0  ;;  %v1158_v8 = vadd.f32 %v1150_v63, %v948_v43 }
 0x1cf   : > { %v1252_v30 = vpop.permute.xlu1 %1251  ;;  %v1159_v5 = vadd.f32 %v1157_v53, %v949_v61 }
 0x1d0   : > { %v1250_v10 = vpop.permute.xlu0 %1249 }
 0x1d1   : > { %v1254_v18 = vsel %vm1253_vm3, %v1250_v10, %v1252_v30  ;;  %v1255_v33 = vsel %vm1253_vm3, %v1252_v30, %v1250_v10 }
 0x1d2   : > { %v1261_v3 = vsel %vm1257_vm4, %v1255_v33, 0.0  ;;  %v1262_v41 = vadd.f32 %v1254_v18, %v1054_v7 }
 0x1d3   : > { %v1263_v11 = vadd.f32 %v1261_v3, %v1055_v46 }
 0x1d4   : > { %v1264_v38 = vadd.f32 %v1262_v41, %v1158_v8 }
 0x1d5   : > { %v1265_v26 = vadd.f32 %v1263_v11, %v1159_v5 }
 0x1d6   : > { %v1268_v42 = vadd.f32 %v1267_v13, %v1264_v38 }
 0x1d7   : > { %v1269_v28 = vadd.f32 %v1267_v13, %v1265_v26 }
 0x1d8   : > { %v1516_v1 = vmul.f32 -1.442695, %v1268_v42 }
 0x1d9   : > { %v1517_v49 = vmul.f32 -1.442695, %v1269_v28 }
 0x1da   : > { %1606 = vpow2.f32 %v1516_v1 }
 0x1db   : > { %1608 = vpow2.f32 %v1517_v49 }
 0x1e4   : > { %v1607_v20 = vpop.eup %1606 }
 0x1e5   : > { %v1609_v37 = vpop.eup %1608  ;;  %v1276_v40 = vadd.f32 1.0, %v1607_v20 }
 0x1e6   : > { %v1277_v48 = vadd.f32 1.0, %v1609_v37 }
 0x1e7   : > { %1610 = vrcp.f32 %v1276_v40 }
 0x1e8   : > { %1612 = vrcp.f32 %v1277_v48 }
 0x1f1   : > { %v1611_v54 = vpop.eup %1610 }
 0x1f2   : > { %v1613_v62 = vpop.eup %1612  ;;  %v1285_v21 = vrot.slane %v1611_v54, %v2341_v12 }
 0x1f3   : > { %v1289_v6 = vrot.slane %v1613_v62, %v2341_v12 }
 0x1f5   : > { %v1292_v36 = vcombine.low %v1285_v21, %v1289_v6 }
 0x1f7   : > { %v1294_v4 = vmul.f32 %v1614_v57, %v1292_v36 }
 0x1f9   : > { %1295 = vst [vmem:[%s211_s30] sm:$0xff] %v1294_v4 }
 0x1fa   : > { %1699 = shalt.err (!%p1696_p3)
}
 0x1fb   : > { %s1700_s7 = scalar_lea.hbm %s2926_s28, 128  ;;  %s1704_s6 = scalar_lea.hbm %s3284_s25, 256 }
 0x1fc   : > { %p1701_p1 = scmp.ne.s32.totalorder %s2926_s28, %s1700_s7  ;;  %p1705_p2 = scmp.lt.u32.totalorder %s2926_s28, %s3284_s25 }
 0x1fd   : > { %p1706_p0 = scmp.lt.u32.totalorder %s1704_s6, %s1700_s7  ;;  %p1708_p11 = scmp.lt.u32.totalorder %s1700_s7, %s2926_s28 }
 0x1fe   : > { %p1702_p5 = pnand %p1701_p1, %p3285_p4 }
 0x1ff   : > { %p1707_p8 = por %p1706_p0, %p1705_p2 }
 0x200   : > { %p1703_p10 = pneg %p1702_p5 }
 0x201   : > { %p1709_p6 = por %p1708_p11, %p1707_p8 }
 0x203   : > { %p1710_p9 = pnand %p1709_p6, %p1703_p10 }
 0x205   : > { %1713 = shalt.err (!%p1710_p9)
}
 0x206   : > { %1535 = dma.vmem_to_hbm [thread:$0]  (%p3285_p4), %s2928_s9, 128, %s2926_s28, %s1297_s17  }
 0x207 PF: > { %s3286_s3 = sld [smem:[#allocation14_spill]]  ;;  %s3287_s4 = sld [smem:[#allocation19_spill]] }
 0x208   : > { %s3288_s1 = sld [smem:[#allocation17_spill]] }
 0x20d   : > { %s1323_s8 = sand.u32 1, %s3286_s3   ;;  %p3289_p12 = scmp.ne.s32.totalorder %s3287_s4, 0 }
 0x20e   : > { %p3290_p7 = scmp.ge.s32.totalorder %s3288_s1, 2  ;;  %s1324_s13 = scalar_lea.sflag [#allocation4], %s1323_s8 }
 0x210   : > { %p1549_p13 = pnand %p3290_p7, %p3289_p12 }
 0x212   : > { %1743 = dma.done.wait (!%p1549_p13), %s1324_s13, 128  }
 0x213   : > { %1745 = vsyncadd (!%p1549_p13), %s1324_s13, 4294967168  ;;  %s3291_s15 = sld [smem:[#allocation20_spill]]  ;;  %s3292_s12 = sld [smem:[#allocation15_spill]] }
 0x214   : > { %s3293_s13 = sld [smem:[#allocation16_spill]]  ;;  %s3294_s14 = sld [smem:[#allocation21_spill]] }
 0x219   : > { %p18_p3 = scmp.ge.s32.totalorder %s3291_s15, 4  }
 0x21b   :  { %20 = sbr.rel (!%p18_p3) target bundleno = 12 (0xc), region = 87 }
 0x222   :  { %1329 = vsyncpa [#allocation3], 1 }
 0x223   :  { %1331 = vsyncpa [#allocation3 + $0x1], 1 }
 0x224   :  { %1332 = vsyncpa [#allocation8], 1 }
 0x225   :  { %1334 = vsyncpa [#allocation8 + $0x1], 1 }
 0x226   :  { %1335 = vsyncpa [#allocation4], 1 }
 0x227   :  { %1337 = vsyncpa [#allocation4 + $0x1], 1 }
 0x228   :  { %1338 = vsyncpa [#allocation5], 1 }
 0x229   :  { %1340 = vsyncpa [#allocation5 + $0x1], 1 }

</bundles_post_ra>
